<compile_context>
chip_gen: v7x
topology: tpu7x:2x2x1
jax: 0.10.0
libtpu: 0.0.40
codegen_flags: <defaults>
</compile_context>

<pallas_src>
import functools

import jax
import jax.numpy as jnp
from jax.experimental import pallas as pl
from jax.experimental.pallas import tpu as pltpu


# ----------------------------- in-kernel helpers -----------------------------

def _layernorm(x, g, b, eps):
    # PyTorch nn.LayerNorm: biased variance over last dim (f32 throughout).
    mu = jnp.mean(x, axis=-1, keepdims=True)
    var = jnp.mean((x - mu) ** 2, axis=-1, keepdims=True)
    return (x - mu) * jax.lax.rsqrt(var + eps) * g + b


def _gelu(x):
    # GPT-2 tanh-approx gelu (f32; tanh goes to the EUP).
    return 0.5 * x * (1.0 + jnp.tanh(
        jnp.sqrt(2.0 / jnp.pi) * (x + 0.044715 * x * x * x)))


def _vmem_limit_bytes():
    # Adaptive scoped-VMEM limit: ~3/4 of physical, capped at 100 MiB
    # (v5e/v6e: 128 MiB physical; v7x: 64 MiB per TensorCore).
    try:
        cap = int(pltpu.get_tpu_info().vmem_capacity_bytes)
    except Exception:
        cap = 64 * 1024 * 1024
    return int(max(32 * 1024 * 1024, min(100 * 1024 * 1024, cap * 3 // 4)))


# --------------- fused (all layers + final LN + classifier) kernel ------------

def _gpt2_kernel(x_ref,
                 ln1g_ref, ln1b_ref, wqkv_ref, bqkv_ref, wpr_ref, bpr_ref,
                 ln2g_ref, ln2b_ref, wfc_ref, bfc_ref, wmlp_ref, bmlp_ref,
                 lnfg_ref, lnfb_ref, wcls_ref, bcls_ref,
                 logits_ref,
                 resid_ref, mask_ref,
                 *, n_head, eps):
    l = pl.program_id(1)
    n_layers = pl.num_programs(1)
    bf16 = jnp.bfloat16
    S, H = resid_ref.shape

    # Layer 0 of each batch element: load embedding into the VMEM-resident
    # residual stream and build the causal mask once (reused by every layer).
    @pl.when(l == 0)
    def _():
        resid_ref[...] = x_ref[...]
        row = jax.lax.broadcasted_iota(jnp.int32, (S, S), 0)
        col = jax.lax.broadcasted_iota(jnp.int32, (S, S), 1)
        mask_ref[...] = (row >= col).astype(jnp.float32)

    x = resid_ref[...]                         # (S, H) f32 residual stream
    causal = mask_ref[...] > 0.5               # (S, S) bool

    # --- attention ---
    a = _layernorm(x, ln1g_ref[...], ln1b_ref[...], eps).astype(bf16)
    # Head-batched QKV projection against head-major weights (3*n_head, H, hd);
    # the 1/sqrt(hd) scale is pre-folded into the Q slices of W/b.
    a_h = jnp.broadcast_to(a, (3 * n_head,) + a.shape)          # (3n, S, H)
    qkv = jnp.einsum('hsk,hkd->hsd', a_h, wqkv_ref[...],
                     preferred_element_type=jnp.float32) + bqkv_ref[...]
    q3 = qkv[:n_head].astype(bf16)                               # (n_head, S, hd)
    k3 = qkv[n_head:2 * n_head].astype(bf16)
    v3 = qkv[2 * n_head:].astype(bf16)

    s = jnp.einsum('hqd,hkd->hqk', q3, k3,
                   preferred_element_type=jnp.float32)           # (n_head, S, S)
    # GPT2: w = w*b - 1e4*(1-b)  ==  where(mask, w, -1e4)
    s = jnp.where(causal[None, :, :], s, jnp.float32(-1e4))
    s = s - jnp.max(s, axis=-1, keepdims=True)
    e = jnp.exp(s)
    p = e * pl.reciprocal(jnp.sum(e, axis=-1, keepdims=True), approx=True)

    ctx = jnp.einsum('hqk,hkd->hqd', p.astype(bf16), v3,
                     preferred_element_type=jnp.float32)         # (n_head, S, hd)
    # Fused head-merge + output projection: sum_h ctx[h] @ Wproj[h]
    attn_h = jnp.einsum('hqd,hdo->hqo', ctx.astype(bf16), wpr_ref[...],
                        preferred_element_type=jnp.float32)      # (n_head, S, H)
    x1 = x + jnp.sum(attn_h, axis=0) + bpr_ref[...]              # f32 residual add

    # --- MLP ---
    m = _layernorm(x1, ln2g_ref[...], ln2b_ref[...], eps)
    hmid = _gelu(jnp.dot(m.astype(bf16), wfc_ref[...],
                         preferred_element_type=jnp.float32) + bfc_ref[...])
    y = jnp.dot(hmid.astype(bf16), wmlp_ref[...],
                preferred_element_type=jnp.float32) + bmlp_ref[...]
    resid_ref[...] = x1 + y                                      # stays in VMEM

    # --- fused final LayerNorm + classifier on the last layer step ---
    @pl.when(l == n_layers - 1)
    def _():
        xf = _layernorm(resid_ref[...], lnfg_ref[...], lnfb_ref[...], eps)
        logits_ref[...] = jnp.dot(xf.astype(bf16), wcls_ref[...],
                                  preferred_element_type=jnp.float32) + bcls_ref[...]


def gpt2_layers_and_head(x, params, *, n_layer, n_head, eps):
    B, S, H = x.shape
    blk = params["block"]
    CP = params["w_cls_pad"].shape[1]
    hd = H // n_head

    def cspec(shape):
        # Constant index map: weights are DMA'd once and stay VMEM-resident
        # (all layers are deep copies of one Block => identical weights).
        return pl.BlockSpec(shape, lambda b, l: (0,) * len(shape))

    in_specs = [
        pl.BlockSpec((None, S, H), lambda b, l: (b, 0, 0)),      # embeddings (per batch)
        cspec((1, H)), cspec((1, H)),                            # ln_1 gamma/beta
        cspec((3 * n_head, H, hd)), cspec((3 * n_head, 1, hd)),  # c_attn (head-major, Q pre-scaled)
        cspec((n_head, hd, H)), cspec((1, H)),                   # attn c_proj (head-major)
        cspec((1, H)), cspec((1, H)),                            # ln_2 gamma/beta
        cspec((H, 4 * H)), cspec((1, 4 * H)),                    # mlp c_fc
        cspec((4 * H, H)), cspec((1, H)),                        # mlp c_proj
        cspec((1, H)), cspec((1, H)),                            # ln_f gamma/beta
        cspec((H, CP)), cspec((1, CP)),                          # classifier (lane-padded)
    ]

    return pl.pallas_call(
        functools.partial(_gpt2_kernel, n_head=n_head, eps=eps),
        out_shape=jax.ShapeDtypeStruct((B, S, CP), jnp.float32),
        grid=(B, n_layer),
        in_specs=in_specs,
        # Only the lane-dense padded logits leave the kernel; written back to HBM
        # once per batch element (index map constant over the layer axis).
        out_specs=pl.BlockSpec((None, S, CP), lambda b, l: (b, 0, 0)),
        scratch_shapes=[pltpu.VMEM((S, H), jnp.float32),   # residual stream
                        pltpu.VMEM((S, S), jnp.float32)],  # hoisted causal mask
        compiler_params=pltpu.CompilerParams(
            dimension_semantics=("parallel", "arbitrary"),
            vmem_limit_bytes=_vmem_limit_bytes()),
    )(x,
      blk["ln1_g"], blk["ln1_b"], blk["w_qkv_h"], blk["b_qkv_h"],
      blk["w_apr_h"], blk["b_apr"], blk["ln2_g"], blk["ln2_b"],
      blk["w_fc"], blk["b_fc"], blk["w_mpr"], blk["b_mpr"],
      params["lnf_g"], params["lnf_b"], params["w_cls_pad"], params["b_cls_pad"])


# ------------------------------- full forward ---------------------------------

def sub_gpt2_forward(input_ids, params, *, n_layer, n_head, eps, n_cls):
    B, S = input_ids.shape
    # GPT2Embedding: wte[input_ids] + wpe[arange(S)]  (token_type_ids None, past None)
    tok = jnp.take(params["wte"], input_ids, axis=0)            # (B, S, H)
    pos = params["wpe"][:S][None, :, :]                          # (1, S, H)
    x = (tok + pos).astype(jnp.float32)

    logits_pad = gpt2_layers_and_head(x, params, n_layer=n_layer,
                                      n_head=n_head, eps=eps)
    # labels=None path: forward returns logits (B, S, num_classes)
    return logits_pad[..., :n_cls]


# ------------------------------- parameter init --------------------------------

def init_params(key, *, vocab, n_positions, H, n_head, n_cls, init_range=0.02):
    ks = jax.random.split(key, 7)
    f32, bf16 = jnp.float32, jnp.bfloat16
    hd = H // n_head

    def nrm(k, shape):
        return (init_range * jax.random.normal(k, shape)).astype(f32)

    # One transformer Block: the PyTorch __init__ deep-copies it n_layer times, so
    # every layer shares identical weights -> pass them once (no layer stacking).
    w_qkv = nrm(ks[0], (H, 3 * H))               # Conv1D c_attn (in, out)
    b_qkv = jnp.zeros((3 * H,), f32)
    # Fold the 1/sqrt(head_dim) attention scale into the Q slices (numerically exact).
    scale = 1.0 / float(hd) ** 0.5
    w_qkv = w_qkv.at[:, :H].multiply(scale)
    b_qkv = b_qkv.at[:H].multiply(scale)
    # Head-major kernel layout: (3*n_head, H, hd) / (3*n_head, 1, hd),
    # ordered [q heads | k heads | v heads] to match the Conv1D column layout.
    w_qkv_h = w_qkv.reshape(H, 3 * n_head, hd).transpose(1, 0, 2).astype(bf16)
    b_qkv_h = b_qkv.reshape(3 * n_head, 1, hd)

    w_apr = nrm(ks[1], (H, H))                   # attn c_proj; rows = concat'd heads
    w_apr_h = w_apr.reshape(n_head, hd, H).astype(bf16)

    block = dict(
        ln1_g=jnp.ones((1, H), f32), ln1_b=jnp.zeros((1, H), f32),
        w_qkv_h=w_qkv_h, b_qkv_h=b_qkv_h,
        w_apr_h=w_apr_h, b_apr=jnp.zeros((1, H), f32),
        ln2_g=jnp.ones((1, H), f32), ln2_b=jnp.zeros((1, H), f32),
        w_fc=nrm(ks[2], (H, 4 * H)).astype(bf16), b_fc=jnp.zeros((1, 4 * H), f32),
        w_mpr=nrm(ks[3], (4 * H, H)).astype(bf16), b_mpr=jnp.zeros((1, H), f32),
    )

    # Classifier padded to a lane-dense 128-multiple width (dense vst; sliced outside).
    CP = max(128, ((n_cls + 127) // 128) * 128)
    w_cls = nrm(ks[4], (H, n_cls))
    w_cls_pad = jnp.zeros((H, CP), bf16).at[:, :n_cls].set(w_cls.astype(bf16))
    b_cls_pad = jnp.zeros((1, CP), f32)

    return dict(
        wte=nrm(ks[5], (vocab, H)),
        wpe=nrm(ks[6], (n_positions, H)),
        block=block,
        lnf_g=jnp.ones((1, H), f32), lnf_b=jnp.zeros((1, H), f32),
        w_cls_pad=w_cls_pad, b_cls_pad=b_cls_pad,
    )


# ----------------------------------- main --------------------------------------

if __name__ == "__main__":
    # Small config consistent with the module's args dict.
    B, S = 2, 8
    H, n_head, n_layer = 32, 4, 2
    vocab, n_positions, n_cls = 100, 16, 2
    eps = 1e-5

    key = jax.random.PRNGKey(0)
    k_par, k_ids = jax.random.split(key)
    params = init_params(k_par, vocab=vocab, n_positions=n_positions,
                         H=H, n_head=n_head, n_cls=n_cls)
    input_ids = jax.random.randint(k_ids, (B, S), 0, vocab, dtype=jnp.int32)

    logits = sub_gpt2_forward(input_ids, params, n_layer=n_layer, n_head=n_head,
                              eps=eps, n_cls=n_cls)
    logits = jax.block_until_ready(logits)
    assert logits.shape == (B, S, n_cls) and logits.dtype == jnp.float32
    print("KERNEL_OK")
</pallas_src>

<mosaic_0001>
module attributes {stable_mosaic.version = 11 : i64} {
  func.func @_gpt2_kernel(%arg0: i32, %arg1: i32, %arg2: memref<1x8x32xf32, #tpu.memory_space<vmem>>, %arg3: memref<1x32xf32, #tpu.memory_space<vmem>>, %arg4: memref<1x32xf32, #tpu.memory_space<vmem>>, %arg5: memref<12x32x8xbf16, #tpu.memory_space<vmem>>, %arg6: memref<12x1x8xf32, #tpu.memory_space<vmem>>, %arg7: memref<4x8x32xbf16, #tpu.memory_space<vmem>>, %arg8: memref<1x32xf32, #tpu.memory_space<vmem>>, %arg9: memref<1x32xf32, #tpu.memory_space<vmem>>, %arg10: memref<1x32xf32, #tpu.memory_space<vmem>>, %arg11: memref<32x128xbf16, #tpu.memory_space<vmem>>, %arg12: memref<1x128xf32, #tpu.memory_space<vmem>>, %arg13: memref<128x32xbf16, #tpu.memory_space<vmem>>, %arg14: memref<1x32xf32, #tpu.memory_space<vmem>>, %arg15: memref<1x32xf32, #tpu.memory_space<vmem>>, %arg16: memref<1x32xf32, #tpu.memory_space<vmem>>, %arg17: memref<32x128xbf16, #tpu.memory_space<vmem>>, %arg18: memref<1x128xf32, #tpu.memory_space<vmem>>, %arg19: memref<1x8x128xf32, #tpu.memory_space<vmem>>, %arg20: memref<8x32xf32, #tpu.memory_space<vmem>>, %arg21: memref<8x8xf32, #tpu.memory_space<vmem>>) attributes {dimension_semantics = [#tpu.dimension_semantics<parallel>, #tpu.dimension_semantics<arbitrary>], iteration_bounds = array<i64: 2, 2>, scalar_prefetch = 0 : i64, scratch_operands = 2 : i64, tpu.core_type = #tpu.core_type<tc>, window_params = [{transform_indices = @transform_0, window_bounds = array<i64: 1, 8, 32>}, {pipeline_mode = #tpu.pipeline_mode<synchronous>, transform_indices = @transform_1, window_bounds = array<i64: 1, 32>}, {pipeline_mode = #tpu.pipeline_mode<synchronous>, transform_indices = @transform_2, window_bounds = array<i64: 1, 32>}, {pipeline_mode = #tpu.pipeline_mode<synchronous>, transform_indices = @transform_3, window_bounds = array<i64: 12, 32, 8>}, {pipeline_mode = #tpu.pipeline_mode<synchronous>, transform_indices = @transform_4, window_bounds = array<i64: 12, 1, 8>}, {pipeline_mode = #tpu.pipeline_mode<synchronous>, transform_indices = @transform_5, window_bounds = array<i64: 4, 8, 32>}, {pipeline_mode = #tpu.pipeline_mode<synchronous>, transform_indices = @transform_6, window_bounds = array<i64: 1, 32>}, {pipeline_mode = #tpu.pipeline_mode<synchronous>, transform_indices = @transform_7, window_bounds = array<i64: 1, 32>}, {pipeline_mode = #tpu.pipeline_mode<synchronous>, transform_indices = @transform_8, window_bounds = array<i64: 1, 32>}, {pipeline_mode = #tpu.pipeline_mode<synchronous>, transform_indices = @transform_9, window_bounds = array<i64: 32, 128>}, {pipeline_mode = #tpu.pipeline_mode<synchronous>, transform_indices = @transform_10, window_bounds = array<i64: 1, 128>}, {pipeline_mode = #tpu.pipeline_mode<synchronous>, transform_indices = @transform_11, window_bounds = array<i64: 128, 32>}, {pipeline_mode = #tpu.pipeline_mode<synchronous>, transform_indices = @transform_12, window_bounds = array<i64: 1, 32>}, {pipeline_mode = #tpu.pipeline_mode<synchronous>, transform_indices = @transform_13, window_bounds = array<i64: 1, 32>}, {pipeline_mode = #tpu.pipeline_mode<synchronous>, transform_indices = @transform_14, window_bounds = array<i64: 1, 32>}, {pipeline_mode = #tpu.pipeline_mode<synchronous>, transform_indices = @transform_15, window_bounds = array<i64: 32, 128>}, {pipeline_mode = #tpu.pipeline_mode<synchronous>, transform_indices = @transform_16, window_bounds = array<i64: 1, 128>}, {transform_indices = @transform_17, window_bounds = array<i64: 1, 8, 128>}]} {
    %c0_i32 = arith.constant 0 : i32
    %0 = arith.cmpi eq, %arg1, %c0_i32 : i32
    %1 = arith.extui %0 : i1 to i32
    %c0_i32_0 = arith.constant 0 : i32
    %2 = arith.cmpi ne, %1, %c0_i32_0 : i32
    scf.if %2 {
      %c0_58 = arith.constant 0 : index
      %c0_59 = arith.constant 0 : index
      %c0_60 = arith.constant 0 : index
      %126 = vector.load %arg2[%c0_58, %c0_59, %c0_60] : memref<1x8x32xf32, #tpu.memory_space<vmem>>, vector<1x8x32xf32>
      %127 = vector.shape_cast %126 : vector<1x8x32xf32> to vector<8x32xf32>
      %c0_61 = arith.constant 0 : index
      %c0_62 = arith.constant 0 : index
      %128 = vector.load %arg20[%c0_61, %c0_62] : memref<8x32xf32, #tpu.memory_space<vmem>>, vector<8x32xf32>
      tpu.vector_store %arg20[%c0_61, %c0_62], %127 {strides = array<i32>} : memref<8x32xf32, #tpu.memory_space<vmem>>, vector<8x32xf32>,
      %129 = tpu.iota {dimensions = array<i32: 0>} : vector<8x8xi32>
      %130 = tpu.iota {dimensions = array<i32: 1>} : vector<8x8xi32>
      %131 = arith.cmpi sge, %129, %130 : vector<8x8xi32>
      %132 = arith.extui %131 : vector<8x8xi1> to vector<8x8xi32>
      %133 = arith.sitofp %132 : vector<8x8xi32> to vector<8x8xf32>
      %c0_63 = arith.constant 0 : index
      %c0_64 = arith.constant 0 : index
      %134 = vector.load %arg21[%c0_63, %c0_64] : memref<8x8xf32, #tpu.memory_space<vmem>>, vector<8x8xf32>
      tpu.vector_store %arg21[%c0_63, %c0_64], %133 {strides = array<i32>} : memref<8x8xf32, #tpu.memory_space<vmem>>, vector<8x8xf32>,
    } else {
    }
    %c0 = arith.constant 0 : index
    %c0_1 = arith.constant 0 : index
    %3 = vector.load %arg20[%c0, %c0_1] : memref<8x32xf32, #tpu.memory_space<vmem>>, vector<8x32xf32>
    %c0_2 = arith.constant 0 : index
    %c0_3 = arith.constant 0 : index
    %4 = vector.load %arg21[%c0_2, %c0_3] : memref<8x8xf32, #tpu.memory_space<vmem>>, vector<8x8xf32>
    %cst = arith.constant 5.000000e-01 : f32
    %5 = vector.broadcast %cst : f32 to vector<8x8xf32>
    %6 = arith.cmpf ogt, %4, %5 : vector<8x8xf32>
    %c0_4 = arith.constant 0 : index
    %c0_5 = arith.constant 0 : index
    %7 = vector.load %arg3[%c0_4, %c0_5] : memref<1x32xf32, #tpu.memory_space<vmem>>, vector<1x32xf32>
    %c0_6 = arith.constant 0 : index
    %c0_7 = arith.constant 0 : index
    %8 = vector.load %arg4[%c0_6, %c0_7] : memref<1x32xf32, #tpu.memory_space<vmem>>, vector<1x32xf32>
    %cst_8 = arith.constant dense<0.000000e+00> : vector<8xf32>
    %9 = vector.multi_reduction <add>, %3, %cst_8 [1] : vector<8x32xf32> to vector<8xf32>
    %10 = vector.shape_cast %9 : vector<8xf32> to vector<8x1xf32>
    %cst_9 = arith.constant 3.200000e+01 : f32
    %11 = vector.broadcast %cst_9 : f32 to vector<8x1xf32>
    %12 = arith.divf %10, %11 : vector<8x1xf32>
    %13 = vector.broadcast %12 : vector<8x1xf32> to vector<8x32xf32>
    %14 = arith.subf %3, %13 : vector<8x32xf32>
    %15 = arith.mulf %14, %14 : vector<8x32xf32>
    %cst_10 = arith.constant dense<0.000000e+00> : vector<8xf32>
    %16 = vector.multi_reduction <add>, %15, %cst_10 [1] : vector<8x32xf32> to vector<8xf32>
    %17 = vector.shape_cast %16 : vector<8xf32> to vector<8x1xf32>
    %cst_11 = arith.constant 3.200000e+01 : f32
    %18 = vector.broadcast %cst_11 : f32 to vector<8x1xf32>
    %19 = arith.divf %17, %18 : vector<8x1xf32>
    %20 = vector.broadcast %12 : vector<8x1xf32> to vector<8x32xf32>
    %21 = arith.subf %3, %20 : vector<8x32xf32>
    %cst_12 = arith.constant 9.99999974E-6 : f32
    %22 = vector.broadcast %cst_12 : f32 to vector<8x1xf32>
    %23 = arith.addf %19, %22 : vector<8x1xf32>
    %24 = math.rsqrt %23 : vector<8x1xf32>
    %25 = vector.broadcast %24 : vector<8x1xf32> to vector<8x32xf32>
    %26 = arith.mulf %21, %25 : vector<8x32xf32>
    %27 = vector.broadcast %7 : vector<1x32xf32> to vector<8x32xf32>
    %28 = arith.mulf %26, %27 : vector<8x32xf32>
    %29 = vector.broadcast %8 : vector<1x32xf32> to vector<8x32xf32>
    %30 = arith.addf %28, %29 : vector<8x32xf32>
    %31 = arith.truncf %30 : vector<8x32xf32> to vector<8x32xbf16>
    %32 = vector.shape_cast %31 : vector<8x32xbf16> to vector<1x8x32xbf16>
    %33 = vector.broadcast %32 : vector<1x8x32xbf16> to vector<12x8x32xbf16>
    %c0_13 = arith.constant 0 : index
    %c0_14 = arith.constant 0 : index
    %c0_15 = arith.constant 0 : index
    %34 = vector.load %arg5[%c0_13, %c0_14, %c0_15] : memref<12x32x8xbf16, #tpu.memory_space<vmem>>, vector<12x32x8xbf16>
    "tpu.trace_start"() <{level = 10 : i32, message = "hsk,hkd->hsd"}> : () -> ()
    %cst_16 = arith.constant dense<0.000000e+00> : vector<12x8x8xf32>
    %35 = tpu.matmul %33, %34, %cst_16 {dimension_numbers = #tpu.dot_dimension_numbers<[2], [1], [1], [2], [0, 0, 0, 1, 1, 2], [0], [0]>} : vector<12x8x32xbf16>, vector<12x32x8xbf16>, vector<12x8x8xf32> -> vector<12x8x8xf32>
    "tpu.trace_stop"() : () -> ()
    %c0_17 = arith.constant 0 : index
    %c0_18 = arith.constant 0 : index
    %c0_19 = arith.constant 0 : index
    %36 = vector.load %arg6[%c0_17, %c0_18, %c0_19] : memref<12x1x8xf32, #tpu.memory_space<vmem>>, vector<12x1x8xf32>
    %37 = vector.broadcast %36 : vector<12x1x8xf32> to vector<12x8x8xf32>
    %38 = arith.addf %35, %37 : vector<12x8x8xf32>
    %39 = vector.extract_strided_slice %38 {offsets = [0, 0, 0], sizes = [4, 8, 8], strides = [1, 1, 1]} : vector<12x8x8xf32> to vector<4x8x8xf32>
    %40 = arith.truncf %39 : vector<4x8x8xf32> to vector<4x8x8xbf16>
    %41 = vector.extract_strided_slice %38 {offsets = [4, 0, 0], sizes = [4, 8, 8], strides = [1, 1, 1]} : vector<12x8x8xf32> to vector<4x8x8xf32>
    %42 = arith.truncf %41 : vector<4x8x8xf32> to vector<4x8x8xbf16>
    %43 = vector.extract_strided_slice %38 {offsets = [8, 0, 0], sizes = [4, 8, 8], strides = [1, 1, 1]} : vector<12x8x8xf32> to vector<4x8x8xf32>
    %44 = arith.truncf %43 : vector<4x8x8xf32> to vector<4x8x8xbf16>
    "tpu.trace_start"() <{level = 10 : i32, message = "hqd,hkd->hqk"}> : () -> ()
    %cst_20 = arith.constant dense<0.000000e+00> : vector<4x8x8xf32>
    %45 = tpu.matmul %40, %42, %cst_20 {dimension_numbers = #tpu.dot_dimension_numbers<[2], [2], [1], [1], [0, 0, 0, 1, 1, 1], [0], [0]>} : vector<4x8x8xbf16>, vector<4x8x8xbf16>, vector<4x8x8xf32> -> vector<4x8x8xf32>
    "tpu.trace_stop"() : () -> ()
    %46 = vector.shape_cast %6 : vector<8x8xi1> to vector<1x8x8xi1>
    %cst_21 = arith.constant -1.000000e+04 : f32
    %47 = vector.shape_cast %46 : vector<1x8x8xi1> to vector<1x8x8xi1>
    %48 = vector.broadcast %47 : vector<1x8x8xi1> to vector<4x8x8xi1>
    %49 = vector.broadcast %cst_21 : f32 to vector<4x8x8xf32>
    %50 = arith.select %48, %45, %49 : vector<4x8x8xi1>, vector<4x8x8xf32>
    %cst_22 = arith.constant dense<0xFF800000> : vector<4x8xf32>
    %51 = vector.multi_reduction <maximumf>, %50, %cst_22 [2] : vector<4x8x8xf32> to vector<4x8xf32>
    %52 = vector.shape_cast %51 : vector<4x8xf32> to vector<4x8x1xf32>
    %53 = vector.broadcast %52 : vector<4x8x1xf32> to vector<4x8x8xf32>
    %54 = arith.subf %50, %53 : vector<4x8x8xf32>
    %55 = math.exp %54 : vector<4x8x8xf32>
    %cst_23 = arith.constant dense<0.000000e+00> : vector<4x8xf32>
    %56 = vector.multi_reduction <add>, %55, %cst_23 [2] : vector<4x8x8xf32> to vector<4x8xf32>
    %57 = vector.shape_cast %56 : vector<4x8xf32> to vector<4x8x1xf32>
    %58 = tpu.reciprocal %57 {approx = true} : vector<4x8x1xf32> -> vector<4x8x1xf32>
    %59 = vector.broadcast %58 : vector<4x8x1xf32> to vector<4x8x8xf32>
    %60 = arith.mulf %55, %59 : vector<4x8x8xf32>
    %61 = arith.truncf %60 : vector<4x8x8xf32> to vector<4x8x8xbf16>
    "tpu.trace_start"() <{level = 10 : i32, message = "hqk,hkd->hqd"}> : () -> ()
    %cst_24 = arith.constant dense<0.000000e+00> : vector<4x8x8xf32>
    %62 = tpu.matmul %61, %44, %cst_24 {dimension_numbers = #tpu.dot_dimension_numbers<[2], [1], [1], [2], [0, 0, 0, 1, 1, 2], [0], [0]>} : vector<4x8x8xbf16>, vector<4x8x8xbf16>, vector<4x8x8xf32> -> vector<4x8x8xf32>
    "tpu.trace_stop"() : () -> ()
    %63 = arith.truncf %62 : vector<4x8x8xf32> to vector<4x8x8xbf16>
    %c0_25 = arith.constant 0 : index
    %c0_26 = arith.constant 0 : index
    %c0_27 = arith.constant 0 : index
    %64 = vector.load %arg7[%c0_25, %c0_26, %c0_27] : memref<4x8x32xbf16, #tpu.memory_space<vmem>>, vector<4x8x32xbf16>
    "tpu.trace_start"() <{level = 10 : i32, message = "hqd,hdo->hqo"}> : () -> ()
    %cst_28 = arith.constant dense<0.000000e+00> : vector<4x8x32xf32>
    %65 = tpu.matmul %63, %64, %cst_28 {dimension_numbers = #tpu.dot_dimension_numbers<[2], [1], [1], [2], [0, 0, 0, 1, 1, 2], [0], [0]>} : vector<4x8x8xbf16>, vector<4x8x32xbf16>, vector<4x8x32xf32> -> vector<4x8x32xf32>
    "tpu.trace_stop"() : () -> ()
    %cst_29 = arith.constant dense<0.000000e+00> : vector<8x32xf32>
    %66 = vector.multi_reduction <add>, %65, %cst_29 [0] : vector<4x8x32xf32> to vector<8x32xf32>
    %67 = arith.addf %3, %66 : vector<8x32xf32>
    %c0_30 = arith.constant 0 : index
    %c0_31 = arith.constant 0 : index
    %68 = vector.load %arg8[%c0_30, %c0_31] : memref<1x32xf32, #tpu.memory_space<vmem>>, vector<1x32xf32>
    %69 = vector.broadcast %68 : vector<1x32xf32> to vector<8x32xf32>
    %70 = arith.addf %67, %69 : vector<8x32xf32>
    %c0_32 = arith.constant 0 : index
    %c0_33 = arith.constant 0 : index
    %71 = vector.load %arg9[%c0_32, %c0_33] : memref<1x32xf32, #tpu.memory_space<vmem>>, vector<1x32xf32>
    %c0_34 = arith.constant 0 : index
    %c0_35 = arith.constant 0 : index
    %72 = vector.load %arg10[%c0_34, %c0_35] : memref<1x32xf32, #tpu.memory_space<vmem>>, vector<1x32xf32>
    %cst_36 = arith.constant dense<0.000000e+00> : vector<8xf32>
    %73 = vector.multi_reduction <add>, %70, %cst_36 [1] : vector<8x32xf32> to vector<8xf32>
    %74 = vector.shape_cast %73 : vector<8xf32> to vector<8x1xf32>
    %cst_37 = arith.constant 3.200000e+01 : f32
    %75 = vector.broadcast %cst_37 : f32 to vector<8x1xf32>
    %76 = arith.divf %74, %75 : vector<8x1xf32>
    %77 = vector.broadcast %76 : vector<8x1xf32> to vector<8x32xf32>
    %78 = arith.subf %70, %77 : vector<8x32xf32>
    %79 = arith.mulf %78, %78 : vector<8x32xf32>
    %cst_38 = arith.constant dense<0.000000e+00> : vector<8xf32>
    %80 = vector.multi_reduction <add>, %79, %cst_38 [1] : vector<8x32xf32> to vector<8xf32>
    %81 = vector.shape_cast %80 : vector<8xf32> to vector<8x1xf32>
    %cst_39 = arith.constant 3.200000e+01 : f32
    %82 = vector.broadcast %cst_39 : f32 to vector<8x1xf32>
    %83 = arith.divf %81, %82 : vector<8x1xf32>
    %84 = vector.broadcast %76 : vector<8x1xf32> to vector<8x32xf32>
    %85 = arith.subf %70, %84 : vector<8x32xf32>
    %cst_40 = arith.constant 9.99999974E-6 : f32
    %86 = vector.broadcast %cst_40 : f32 to vector<8x1xf32>
    %87 = arith.addf %83, %86 : vector<8x1xf32>
    %88 = math.rsqrt %87 : vector<8x1xf32>
    %89 = vector.broadcast %88 : vector<8x1xf32> to vector<8x32xf32>
    %90 = arith.mulf %85, %89 : vector<8x32xf32>
    %91 = vector.broadcast %71 : vector<1x32xf32> to vector<8x32xf32>
    %92 = arith.mulf %90, %91 : vector<8x32xf32>
    %93 = vector.broadcast %72 : vector<1x32xf32> to vector<8x32xf32>
    %94 = arith.addf %92, %93 : vector<8x32xf32>
    %95 = arith.truncf %94 : vector<8x32xf32> to vector<8x32xbf16>
    %c0_41 = arith.constant 0 : index
    %c0_42 = arith.constant 0 : index
    %96 = vector.load %arg11[%c0_41, %c0_42] : memref<32x128xbf16, #tpu.memory_space<vmem>>, vector<32x128xbf16>
    %cst_43 = arith.constant dense<0.000000e+00> : vector<8x128xf32>
    %97 = tpu.matmul %95, %96, %cst_43 {dimension_numbers = #tpu.dot_dimension_numbers<[1], [0], [0], [1], [0, 0, 1, 1], [], []>} : vector<8x32xbf16>, vector<32x128xbf16>, vector<8x128xf32> -> vector<8x128xf32>
    %c0_44 = arith.constant 0 : index
    %c0_45 = arith.constant 0 : index
    %98 = vector.load %arg12[%c0_44, %c0_45] : memref<1x128xf32, #tpu.memory_space<vmem>>, vector<1x128xf32>
    %99 = vector.broadcast %98 : vector<1x128xf32> to vector<8x128xf32>
    %100 = arith.addf %97, %99 : vector<8x128xf32>
    %cst_46 = arith.constant 5.000000e-01 : f32
    %101 = vector.broadcast %cst_46 : f32 to vector<8x128xf32>
    %102 = arith.mulf %101, %100 : vector<8x128xf32>
    %cst_47 = arith.constant 0.636619746 : f32
    %103 = math.sqrt %cst_47 : f32
    %cst_48 = arith.constant 4.471500e-02 : f32
    %104 = vector.broadcast %cst_48 : f32 to vector<8x128xf32>
    %105 = arith.mulf %104, %100 : vector<8x128xf32>
    %106 = arith.mulf %105, %100 : vector<8x128xf32>
    %107 = arith.mulf %106, %100 : vector<8x128xf32>
    %108 = arith.addf %100, %107 : vector<8x128xf32>
    %109 = vector.broadcast %103 : f32 to vector<8x128xf32>
    %110 = arith.mulf %109, %108 : vector<8x128xf32>
    %111 = math.tanh %110 : vector<8x128xf32>
    %cst_49 = arith.constant 1.000000e+00 : f32
    %112 = vector.broadcast %cst_49 : f32 to vector<8x128xf32>
    %113 = arith.addf %112, %111 : vector<8x128xf32>
    %114 = arith.mulf %102, %113 : vector<8x128xf32>
    %115 = arith.truncf %114 : vector<8x128xf32> to vector<8x128xbf16>
    %c0_50 = arith.constant 0 : index
    %c0_51 = arith.constant 0 : index
    %116 = vector.load %arg13[%c0_50, %c0_51] : memref<128x32xbf16, #tpu.memory_space<vmem>>, vector<128x32xbf16>
    %cst_52 = arith.constant dense<0.000000e+00> : vector<8x32xf32>
    %117 = tpu.matmul %115, %116, %cst_52 {dimension_numbers = #tpu.dot_dimension_numbers<[1], [0], [0], [1], [0, 0, 1, 1], [], []>} : vector<8x128xbf16>, vector<128x32xbf16>, vector<8x32xf32> -> vector<8x32xf32>
    %c0_53 = arith.constant 0 : index
    %c0_54 = arith.constant 0 : index
    %118 = vector.load %arg14[%c0_53, %c0_54] : memref<1x32xf32, #tpu.memory_space<vmem>>, vector<1x32xf32>
    %119 = vector.broadcast %118 : vector<1x32xf32> to vector<8x32xf32>
    %120 = arith.addf %117, %119 : vector<8x32xf32>
    %121 = arith.addf %70, %120 : vector<8x32xf32>
    %c0_55 = arith.constant 0 : index
    %c0_56 = arith.constant 0 : index
    %122 = vector.load %arg20[%c0_55, %c0_56] : memref<8x32xf32, #tpu.memory_space<vmem>>, vector<8x32xf32>
    tpu.vector_store %arg20[%c0_55, %c0_56], %121 {strides = array<i32>} : memref<8x32xf32, #tpu.memory_space<vmem>>, vector<8x32xf32>,
    %c1_i32 = arith.constant 1 : i32
    %123 = arith.cmpi eq, %arg1, %c1_i32 : i32
    %124 = arith.extui %123 : i1 to i32
    %c0_i32_57 = arith.constant 0 : i32
    %125 = arith.cmpi ne, %124, %c0_i32_57 : i32
    scf.if %125 {
      %c0_58 = arith.constant 0 : index
      %c0_59 = arith.constant 0 : index
      %126 = vector.load %arg20[%c0_58, %c0_59] : memref<8x32xf32, #tpu.memory_space<vmem>>, vector<8x32xf32>
      %c0_60 = arith.constant 0 : index
      %c0_61 = arith.constant 0 : index
      %127 = vector.load %arg15[%c0_60, %c0_61] : memref<1x32xf32, #tpu.memory_space<vmem>>, vector<1x32xf32>
      %c0_62 = arith.constant 0 : index
      %c0_63 = arith.constant 0 : index
      %128 = vector.load %arg16[%c0_62, %c0_63] : memref<1x32xf32, #tpu.memory_space<vmem>>, vector<1x32xf32>
      %cst_64 = arith.constant dense<0.000000e+00> : vector<8xf32>
      %129 = vector.multi_reduction <add>, %126, %cst_64 [1] : vector<8x32xf32> to vector<8xf32>
      %130 = vector.shape_cast %129 : vector<8xf32> to vector<8x1xf32>
      %cst_65 = arith.constant 3.200000e+01 : f32
      %131 = vector.broadcast %cst_65 : f32 to vector<8x1xf32>
      %132 = arith.divf %130, %131 : vector<8x1xf32>
      %133 = vector.broadcast %132 : vector<8x1xf32> to vector<8x32xf32>
      %134 = arith.subf %126, %133 : vector<8x32xf32>
      %135 = arith.mulf %134, %134 : vector<8x32xf32>
      %cst_66 = arith.constant dense<0.000000e+00> : vector<8xf32>
      %136 = vector.multi_reduction <add>, %135, %cst_66 [1] : vector<8x32xf32> to vector<8xf32>
      %137 = vector.shape_cast %136 : vector<8xf32> to vector<8x1xf32>
      %cst_67 = arith.constant 3.200000e+01 : f32
      %138 = vector.broadcast %cst_67 : f32 to vector<8x1xf32>
      %139 = arith.divf %137, %138 : vector<8x1xf32>
      %140 = vector.broadcast %132 : vector<8x1xf32> to vector<8x32xf32>
      %141 = arith.subf %126, %140 : vector<8x32xf32>
      %cst_68 = arith.constant 9.99999974E-6 : f32
      %142 = vector.broadcast %cst_68 : f32 to vector<8x1xf32>
      %143 = arith.addf %139, %142 : vector<8x1xf32>
      %144 = math.rsqrt %143 : vector<8x1xf32>
      %145 = vector.broadcast %144 : vector<8x1xf32> to vector<8x32xf32>
      %146 = arith.mulf %141, %145 : vector<8x32xf32>
      %147 = vector.broadcast %127 : vector<1x32xf32> to vector<8x32xf32>
      %148 = arith.mulf %146, %147 : vector<8x32xf32>
      %149 = vector.broadcast %128 : vector<1x32xf32> to vector<8x32xf32>
      %150 = arith.addf %148, %149 : vector<8x32xf32>
      %151 = arith.truncf %150 : vector<8x32xf32> to vector<8x32xbf16>
      %c0_69 = arith.constant 0 : index
      %c0_70 = arith.constant 0 : index
      %152 = vector.load %arg17[%c0_69, %c0_70] : memref<32x128xbf16, #tpu.memory_space<vmem>>, vector<32x128xbf16>
      %cst_71 = arith.constant dense<0.000000e+00> : vector<8x128xf32>
      %153 = tpu.matmul %151, %152, %cst_71 {dimension_numbers = #tpu.dot_dimension_numbers<[1], [0], [0], [1], [0, 0, 1, 1], [], []>} : vector<8x32xbf16>, vector<32x128xbf16>, vector<8x128xf32> -> vector<8x128xf32>
      %c0_72 = arith.constant 0 : index
      %c0_73 = arith.constant 0 : index
      %154 = vector.load %arg18[%c0_72, %c0_73] : memref<1x128xf32, #tpu.memory_space<vmem>>, vector<1x128xf32>
      %155 = vector.broadcast %154 : vector<1x128xf32> to vector<8x128xf32>
      %156 = arith.addf %153, %155 : vector<8x128xf32>
      %c0_74 = arith.constant 0 : index
      %c0_75 = arith.constant 0 : index
      %c0_76 = arith.constant 0 : index
      %157 = vector.load %arg19[%c0_74, %c0_75, %c0_76] : memref<1x8x128xf32, #tpu.memory_space<vmem>>, vector<1x8x128xf32>
      %158 = vector.shape_cast %157 : vector<1x8x128xf32> to vector<8x128xf32>
      %159 = vector.shape_cast %156 : vector<8x128xf32> to vector<1x8x128xf32>
      tpu.vector_store %arg19[%c0_74, %c0_75, %c0_76], %159 {strides = array<i32>} : memref<1x8x128xf32, #tpu.memory_space<vmem>>, vector<1x8x128xf32>,
    } else {
    }
    return
  }
  func.func @transform_0(%arg0: i32, %arg1: i32) -> (i32, i32, i32) {
    %c0_i32 = arith.constant 0 : i32
    %c0_i32_0 = arith.constant 0 : i32
    %c0_i32_1 = arith.constant 0 : i32
    return %arg0, %c0_i32, %c0_i32_0 : i32, i32, i32
  }
  func.func @transform_1(%arg0: i32, %arg1: i32) -> (i32, i32) {
    %c0_i32 = arith.constant 0 : i32
    %c0_i32_0 = arith.constant 0 : i32
    %c0_i32_1 = arith.constant 0 : i32
    return %c0_i32, %c0_i32_0 : i32, i32
  }
  func.func @transform_2(%arg0: i32, %arg1: i32) -> (i32, i32) {
    %c0_i32 = arith.constant 0 : i32
    %c0_i32_0 = arith.constant 0 : i32
    %c0_i32_1 = arith.constant 0 : i32
    return %c0_i32, %c0_i32_0 : i32, i32
  }
  func.func @transform_3(%arg0: i32, %arg1: i32) -> (i32, i32, i32) {
    %c0_i32 = arith.constant 0 : i32
    %c0_i32_0 = arith.constant 0 : i32
    %c0_i32_1 = arith.constant 0 : i32
    %c0_i32_2 = arith.constant 0 : i32
    return %c0_i32, %c0_i32_0, %c0_i32_1 : i32, i32, i32
  }
  func.func @transform_4(%arg0: i32, %arg1: i32) -> (i32, i32, i32) {
    %c0_i32 = arith.constant 0 : i32
    %c0_i32_0 = arith.constant 0 : i32
    %c0_i32_1 = arith.constant 0 : i32
    %c0_i32_2 = arith.constant 0 : i32
    return %c0_i32, %c0_i32_0, %c0_i32_1 : i32, i32, i32
  }
  func.func @transform_5(%arg0: i32, %arg1: i32) -> (i32, i32, i32) {
    %c0_i32 = arith.constant 0 : i32
    %c0_i32_0 = arith.constant 0 : i32
    %c0_i32_1 = arith.constant 0 : i32
    %c0_i32_2 = arith.constant 0 : i32
    return %c0_i32, %c0_i32_0, %c0_i32_1 : i32, i32, i32
  }
  func.func @transform_6(%arg0: i32, %arg1: i32) -> (i32, i32) {
    %c0_i32 = arith.constant 0 : i32
    %c0_i32_0 = arith.constant 0 : i32
    %c0_i32_1 = arith.constant 0 : i32
    return %c0_i32, %c0_i32_0 : i32, i32
  }
  func.func @transform_7(%arg0: i32, %arg1: i32) -> (i32, i32) {
    %c0_i32 = arith.constant 0 : i32
    %c0_i32_0 = arith.constant 0 : i32
    %c0_i32_1 = arith.constant 0 : i32
    return %c0_i32, %c0_i32_0 : i32, i32
  }
  func.func @transform_8(%arg0: i32, %arg1: i32) -> (i32, i32) {
    %c0_i32 = arith.constant 0 : i32
    %c0_i32_0 = arith.constant 0 : i32
    %c0_i32_1 = arith.constant 0 : i32
    return %c0_i32, %c0_i32_0 : i32, i32
  }
  func.func @transform_9(%arg0: i32, %arg1: i32) -> (i32, i32) {
    %c0_i32 = arith.constant 0 : i32
    %c0_i32_0 = arith.constant 0 : i32
    %c0_i32_1 = arith.constant 0 : i32
    return %c0_i32, %c0_i32_0 : i32, i32
  }
  func.func @transform_10(%arg0: i32, %arg1: i32) -> (i32, i32) {
    %c0_i32 = arith.constant 0 : i32
    %c0_i32_0 = arith.constant 0 : i32
    %c0_i32_1 = arith.constant 0 : i32
    return %c0_i32, %c0_i32_0 : i32, i32
  }
  func.func @transform_11(%arg0: i32, %arg1: i32) -> (i32, i32) {
    %c0_i32 = arith.constant 0 : i32
    %c0_i32_0 = arith.constant 0 : i32
    %c0_i32_1 = arith.constant 0 : i32
    return %c0_i32, %c0_i32_0 : i32, i32
  }
  func.func @transform_12(%arg0: i32, %arg1: i32) -> (i32, i32) {
    %c0_i32 = arith.constant 0 : i32
    %c0_i32_0 = arith.constant 0 : i32
    %c0_i32_1 = arith.constant 0 : i32
    return %c0_i32, %c0_i32_0 : i32, i32
  }
  func.func @transform_13(%arg0: i32, %arg1: i32) -> (i32, i32) {
    %c0_i32 = arith.constant 0 : i32
    %c0_i32_0 = arith.constant 0 : i32
    %c0_i32_1 = arith.constant 0 : i32
    return %c0_i32, %c0_i32_0 : i32, i32
  }
  func.func @transform_14(%arg0: i32, %arg1: i32) -> (i32, i32) {
    %c0_i32 = arith.constant 0 : i32
    %c0_i32_0 = arith.constant 0 : i32
    %c0_i32_1 = arith.constant 0 : i32
    return %c0_i32, %c0_i32_0 : i32, i32
  }
  func.func @transform_15(%arg0: i32, %arg1: i32) -> (i32, i32) {
    %c0_i32 = arith.constant 0 : i32
    %c0_i32_0 = arith.constant 0 : i32
    %c0_i32_1 = arith.constant 0 : i32
    return %c0_i32, %c0_i32_0 : i32, i32
  }
  func.func @transform_16(%arg0: i32, %arg1: i32) -> (i32, i32) {
    %c0_i32 = arith.constant 0 : i32
    %c0_i32_0 = arith.constant 0 : i32
    %c0_i32_1 = arith.constant 0 : i32
    return %c0_i32, %c0_i32_0 : i32, i32
  }
  func.func @transform_17(%arg0: i32, %arg1: i32) -> (i32, i32, i32) {
    %c0_i32 = arith.constant 0 : i32
    %c0_i32_0 = arith.constant 0 : i32
    %c0_i32_1 = arith.constant 0 : i32
    return %arg0, %c0_i32, %c0_i32_0 : i32, i32, i32
  }
}

</mosaic_0001>

<bundles_post_ra>
// kernel: tpu_custom_call.1
= control target key start
LH: loop header
LB: loop body
LE: loop exit
PB: predicated region body
PF: predicated region fallthrough
CT: control target
= control target key end

     0   :  { %s3634_s0 = inlined_call_operand.vmem [shape: f32[2,8,32], index: 0, kind: input, shape index: {}]   ;;  %s3635_s1 = inlined_call_operand.vmem [shape: f32[1,32], index: 1, kind: input, shape index: {}]   ;;  %s3636_s2 = inlined_call_operand.vmem [shape: f32[1,32], index: 2, kind: input, shape index: {}]   ;;  %s3637_s3 = inlined_call_operand.vmem [shape: bf16[12,32,8], index: 3, kind: input, shape index: {}]   ;;  %s3638_s4 = inlined_call_operand.vmem [shape: f32[12,1,8], index: 4, kind: input, shape index: {}]   ;;  %s3639_s5 = inlined_call_operand.vmem [shape: bf16[4,8,32], index: 5, kind: input, shape index: {}]   ;;  %s3640_s6 = inlined_call_operand.vmem [shape: f32[1,32], index: 6, kind: input, shape index: {}]   ;;  %s3641_s7 = inlined_call_operand.vmem [shape: f32[1,32], index: 7, kind: input, shape index: {}]   ;;  %s3642_s8 = inlined_call_operand.vmem [shape: f32[1,32], index: 8, kind: input, shape index: {}]   ;;  %s3643_s9 = inlined_call_operand.vmem [shape: bf16[32,128], index: 9, kind: input, shape index: {}]   ;;  %s3644_s10 = inlined_call_operand.vmem [shape: f32[1,128], index: 10, kind: input, shape index: {}]   ;;  %s3645_s11 = inlined_call_operand.vmem [shape: bf16[128,32], index: 11, kind: input, shape index: {}]   ;;  %s3646_s12 = inlined_call_operand.vmem [shape: f32[1,32], index: 12, kind: input, shape index: {}]   ;;  %s3647_s13 = inlined_call_operand.vmem [shape: f32[1,32], index: 13, kind: input, shape index: {}]   ;;  %s3648_s14 = inlined_call_operand.vmem [shape: f32[1,32], index: 14, kind: input, shape index: {}]   ;;  %s3649_s15 = inlined_call_operand.vmem [shape: bf16[32,128], index: 15, kind: input, shape index: {}]   ;;  %s3650_s16 = inlined_call_operand.vmem [shape: f32[1,128], index: 16, kind: input, shape index: {}]   ;;  %s3651_s17 = inlined_call_operand.hbm [shape: f32[2,8,128], index: 17, kind: output, shape index: {}]  }
   0x1   :  { %3661 = sst [smem:[#allocation14_spill]] %s3634_s0 }
   0x2   :  { %3662 = sst [smem:[#allocation15_spill]] %s3635_s1 }
   0x3   :  { %3663 = sst [smem:[#allocation16_spill]] %s3636_s2 }
   0x4   :  { %3664 = sst [smem:[#allocation17_spill]] %s3637_s3 }
   0x5   :  { %3665 = sst [smem:[#allocation18_spill]] %s3638_s4 }
   0x6   :  { %3666 = sst [smem:[#allocation19_spill]] %s3639_s5 }
   0x7   :  { %3667 = sst [smem:[#allocation20_spill]] %s3651_s17 }
   0x8   :  { %22 = vsyncpa [#allocation5], 0 }
   0x9   :  { %24 = vsyncpa [#allocation5 + $0x1], 0  ;;  %s3121_s24 = smov 0   ;;  %s3123_s25 = smov 0  }
   0xa   :  { %s3125_s26 = smov 0   ;;  %s3127_s27 = smov 0  }
   0xb   :  { %s3129_s28 = smov 0   ;;  %s3131_s29 = smov 0  }
   0xc   :  { %s3133_s0 = smov 0   ;;  %s3135_s30 = smov 0  }
   0xd LB: > { %3668 = sst [smem:[#allocation7_spill]] %s2995_s24  ;;  %s2416_s18 = sadd.s32 4294967295, %s3023_s30   ;;  %s3023_s30 = sphi %s3135_s30, %s30_s30   ;;  %s3019_s0 = sphi %s3133_s0, %s3694_s0   ;;  %s3015_s29 = sphi %s3131_s29, %s3693_s29   ;;  %s3011_s28 = sphi %s3129_s28, %s3692_s28   ;;  %s3007_s27 = sphi %s3127_s27, %s3691_s27   ;;  %s3003_s26 = sphi %s3125_s26, %s3697_s26   ;;  %s2999_s25 = sphi %s3123_s25, %s3696_s25   ;;  %s2995_s24 = sphi %s3121_s24, %s3695_s24  }
   0xe   : > { %3669 = sst [smem:[#allocation8_spill]] %s3015_s29  ;;  %s2417_s19 = sadd.s32 4294967294, %s3023_s30  }
   0xf   : > { %3670 = sst [smem:[#allocation9_spill]] %s3019_s0  ;;  %s39_s1 = sadd.s32 1, %s3015_s29 }
  0x10   : > { %3671 = sst [smem:[#allocation10_spill]] %s3023_s30  ;;  %p40_p0 = scmp.ge.s32.totalorder %s39_s1, 2 }
  0x11   : > { %s42_s20 = sadd.s32 1, %s3019_s0  ;;  %p421_p1 = scmp.ne.s32.totalorder %s3003_s26, %s2999_s25 }
  0x12   : > { %p422_p2 = scmp.eq.s32.totalorder %s2416_s18, 3  ;;  %s3699_s1 = smov (%p40_p0, %s39_s1), 0 }
  0x13   : > { %3672 = sst [smem:[#allocation11_spill]] %s3699_s1  ;;  %s3701_s20 = smov (!%p40_p0, %s42_s20), %s3019_s0 }
  0x14   : > { %p3170_p3 = por %p422_p2, %p421_p1  ;;  %p427_p4 = scmp.ne.s32.totalorder %s2999_s25, %s2995_s24 }
  0x15   : > { %p44_p5 = scmp.ge.s32.totalorder %s3701_s20, 2  ;;  %p428_p6 = scmp.eq.s32.totalorder %s2417_s19, 3 }
  0x16   : > { %p2420_p7 = scmp.ge.s32.totalorder %s3023_s30, 1  ;;  %p501_p8 = scmp.lt.s32.totalorder %s3023_s30, 5 }
  0x17   : > { %s3703_s20 = smov (%p44_p5, %s3701_s20), 0  ;;  %p3180_p9 = por %p428_p6, %p427_p4 }
  0x18   : > { %3674 = sst [smem:[#allocation12_spill]] %s3703_s20  ;;  %p502_p10 = pnand %p2420_p7, %p501_p8 }
  0x19   : > { %s3675_s22 = scalar_select %p3180_p9, 1, 0 }
  0x1a   : > { %s408_s23 = ssub.s32 %s3019_s0, %s3703_s20  ;;  %s411_s18 = sadd.s32 1, %s3003_s26 }
  0x1b   : > { %3676 = sst [smem:[#allocation13_spill]] %s3675_s22  ;;  %p409_p11 = scmp.eq.s32.totalorder %s408_s23, 0 }
  0x1c   : > { %505 = sbr.rel (%p502_p10) target bundleno = 2921 (0xb69), region = 88  ;;  %s3660_s19 = sand.u32 (!%p502_p10), 1, %s2999_s25  }
  0x1d   : > { %s3188_s1 = scalar_select %p409_p11, %s3003_s26, %s411_s18  }
  0x1e   : > { %p552_p12 = scmp.lt.s32.totalorder (!%p502_p10), %s3011_s28, 1  ;;  %s3194_s29 = sshll.u32 (!%p502_p10), %s3660_s19, 3 }
  0x1f   : > { %s3677_s20 = sld [smem:[#allocation14_spill]] (!%p502_p10)  ;;  %p2423_p13 = scmp.ne.s32.totalorder (!%p502_p10), %s3007_s27, 0 }
  0x23   : > { %s553_s24 = scalar_select %p552_p12, %s3011_s28, 1 }
  0x24   : > { %560 = sbr.rel (%p2423_p13) target bundleno = 43 (0x2b), region = 92  ;;  %vm562_vm0 = vcmask (!%p2423_p13), 261120   ;;  %v564_v1 = vlaneseq (!%p2423_p13)  ;;  %vm571_vm1 = vcmask (!%p2423_p13), 64512   ;;  %v3025_v4 = vmov (!%p2423_p13), 0.0  }
  0x25   : > { %s2422_s30 = sshll.u32 %s553_s24, 3 }
  0x26   : > { %s555_s0 = scalar_lea.vmem %s3677_s20, %s2422_s30  ;;  %v565_v2 = vshrl.u32 (!%p2423_p13), %v564_v1, 7  ;;  %v567_v3 = vand.u32 (!%p2423_p13), 127, %v564_v1 }
  0x27   : > { %v561_v0 = vld [vmem:[%s555_s0] sm:$0xff] (!%p2423_p13) }
  0x28   : > { %563 = vst.msk [vmem:[#allocation2] sm:$0xff] (!%p2423_p13), %vm562_vm0, %v561_v0  ;;  %vm568_vm2 = vcmp.ge.s32.totalorder (!%p2423_p13), %v565_v2, %v567_v3 }
  0x29   : > { %v2424_v5 = vsel (!%p2423_p13), %vm568_vm2, 1.0, %v3025_v4 }
  0x2a   : > { %572 = vst.msk [vmem:[#allocation3] sm:$0xff] (!%p2423_p13), %vm571_vm1, %v2424_v5 }
  0x2b PF: > { %vm578_vm3 = vcmask 261120   ;;  %s3678_s3 = sld [smem:[#allocation17_spill]]  ;;  %v3026_v15 = vmov 0.0   ;;  %vm3027_vm4 = vmmov 0   ;;  %s3679_s30 = sld [smem:[#allocation15_spill]]  ;;  %vm1379_vm5 = vcmask 64512  }
  0x2c   : > { %2589 = vmatprep.subr.bf16.mxu0 %v3026_v15  ;;  %2613 = vmatprep.subr.bf16.mxu1 %v3026_v15  ;;  %s3680_s2 = sld [smem:[#allocation16_spill]]  ;;  %s3681_s4 = sld [smem:[#allocation18_spill]]  ;;  %vm1621_vm6 = vcmask 1043456  }
  0x2d   : > { %2593 = vmatprep.mubr.msk.bf16.mxu0 %vm3027_vm4, %v3026_v15  ;;  %2617 = vmatprep.mubr.msk.bf16.mxu1 %vm3027_vm4, %v3026_v15  ;;  %s3682_s5 = sld [smem:[#allocation19_spill]]  ;;  %p2503_p0 = scmp.ne.s32.totalorder %s3007_s27, 1 }
  0x2e   : > { %vm3029_vm8 = vmmov (!%p2503_p0), 0   ;;  %s3683_s17 = scalar_lea.vmem (!%p2503_p0), [#allocation4], %s3194_s29 }
  0x2f   : > { %v3202_v6 = vld [vmem:[#allocation2] sm:$0xff] }
  0x30   : > { %v579_v7 = vsel %vm578_vm3, %v3202_v6, 0.0 }
  0x31   : > { %580 = vadd.xlane.f32.xlu0 %v579_v7  ;;  %v2869_v13 = vld [vmem:[%s3678_s3] sm:$0xff]   ;;  %v2870_v14 = vld [vmem:[%s3678_s3 + $0x30] sm:$0xff]   ;;  %v2871_v16 = vld [vmem:[%s3678_s3 + $0x8] sm:$0xff]  }
  0x32   : > { %2590 = vmatpush3.bf16.msra.mxu0 %v2869_v13  ;;  %2614 = vmatpush3.bf16.msra.mxu1 %v2870_v14  ;;  %v2872_v17 = vld [vmem:[%s3678_s3 + $0x38] sm:$0xff]   ;;  %v2425_v22 = vld [vmem:[%s3679_s30] ss:$0 sm:$0xff]  ;;  %v2873_v27 = vld [vmem:[%s3678_s3 + $0x10] sm:$0xff]  }
  0x33   : > { %2591 = vmatprep.subr.bf16.mxu0 %v3026_v15  ;;  %2615 = vmatprep.subr.bf16.mxu1 %v3026_v15  ;;  %v2426_v24 = vld [vmem:[%s3680_s2] ss:$0 sm:$0xff]  ;;  %v2874_v28 = vld [vmem:[%s3678_s3 + $0x50] sm:$0xff]   ;;  %v2875_v30 = vld [vmem:[%s3678_s3 + $0x18] sm:$0xff]  }
  0x34   : > { %v2876_v31 = vld [vmem:[%s3678_s3 + $0x58] sm:$0xff]   ;;  %v2877_v32 = vld [vmem:[%s3678_s3 + $0x20] sm:$0xff]   ;;  %v2878_v33 = vld [vmem:[%s3678_s3 + $0x70] sm:$0xff]  }
  0x35   : > { %v2879_v34 = vld [vmem:[%s3678_s3 + $0x28] sm:$0xff]   ;;  %v2880_v35 = vld [vmem:[%s3678_s3 + $0x78] sm:$0xff]   ;;  %v2881_v36 = vld [vmem:[%s3678_s3 + $0x40] sm:$0xff]  }
  0x36   : > { %2592 = vmatpush3.bf16.msra.mxu0 %v2871_v16  ;;  %2616 = vmatpush3.bf16.msra.mxu1 %v2872_v17  ;;  %v2882_v37 = vld [vmem:[%s3678_s3 + $0x90] sm:$0xff]   ;;  %v2883_v38 = vld [vmem:[%s3678_s3 + $0x48] sm:$0xff]   ;;  %v2884_v39 = vld [vmem:[%s3678_s3 + $0x98] sm:$0xff]  }
  0x37   : > { %2597 = vmatprep.subr.bf16.mxu0 %v3026_v15  ;;  %2629 = vmatprep.subr.bf16.mxu1 %v3026_v15  ;;  %v2885_v40 = vld [vmem:[%s3678_s3 + $0x60] sm:$0xff]   ;;  %v2886_v41 = vld [vmem:[%s3678_s3 + $0xb0] sm:$0xff]   ;;  %v2887_v42 = vld [vmem:[%s3678_s3 + $0x68] sm:$0xff]  }
  0x38   : > { %v2888_v43 = vld [vmem:[%s3678_s3 + $0xb8] sm:$0xff]   ;;  %v2889_v44 = vld [vmem:[%s3678_s3 + $0x80] sm:$0xff]   ;;  %v2890_v45 = vld [vmem:[%s3678_s3 + $0x88] sm:$0xff]  }
  0x39   : > { %v2891_v46 = vld [vmem:[%s3678_s3 + $0xa0] sm:$0xff]   ;;  %v2892_v47 = vld [vmem:[%s3678_s3 + $0xa8] sm:$0xff]  }
  0x3a   : > { %v2432_v56 = vld [vmem:[%s3681_s4 + $0x5] ss:$0 sm:$0xff]  ;;  %v2428_v3 = vld [vmem:[%s3681_s4 + $0x1] ss:$0 sm:$0xff]  ;;  %v2434_v5 = vld [vmem:[%s3681_s4 + $0x7] ss:$0 sm:$0xff] }
  0xbe   : > { %v581_v8 = vpop.xlane.xlu0 %580 }
  0xbf   : > { %v583_v9 = vmul.f32 0.03125, %v581_v8 }
  0xc1   : > { %v584_v10 = vsub.f32 %v3202_v6, %v583_v9 }
  0xc3   : > { %v585_v11 = vmul.f32 %v584_v10, %v584_v10 }
  0xc5   : > { %v586_v12 = vsel %vm578_vm3, %v585_v11, 0.0 }
  0xc6   : > { %587 = vadd.xlane.f32.xlu0 %v586_v12 }
 0x153   : > { %v588_v18 = vpop.xlane.xlu0 %587 }
 0x154   : > { %v589_v19 = vmul.f32 0.03125, %v588_v18 }
 0x156   : > { %v590_v20 = vadd.f32 1e-05, %v589_v19 }
 0x158   : > { %2903 = vrsqrt.f32 %v590_v20  ;;  %v2430_v20 = vld [vmem:[%s3681_s4 + $0x3] ss:$0 sm:$0xff] }
 0x162   : > { %v2904_v21 = vpop.eup %2903 }
 0x163   : > { %v592_v23 = vmul.f32 %v2904_v21, %v584_v10 }
 0x165   : > { %v599_v25 = vmul.f32 %v2425_v22, %v592_v23  ;;  %v2431_v22 = vld [vmem:[%s3681_s4 + $0x4] ss:$0 sm:$0xff]  ;;  %v2436_v23 = vld [vmem:[%s3681_s4 + $0x9] ss:$0 sm:$0xff] }
 0x167   : > { %v606_v26 = vadd.f32 %v2426_v24, %v599_v25 }
 0x169   : > { %v3242_v29 = vpack.c.bf16 %v606_v26, %v606_v26 }
 0x16b   : > { %2594 = vmatmul.mubr.msk.bf16.vlgmr.msra.gmra.mrb[0].mxu0 %vm578_vm3, %v3242_v29  ;;  %2618 = vmatmul.mubr.msk.bf16.vlgmr.msra.gmra.mrb[0].mxu1 %vm578_vm3, %v3242_v29 }
 0x16c   : > { %2598 = vmatpush3.bf16.msra.mxu0 %v2873_v27  ;;  %2630 = vmatpush3.bf16.msra.mxu1 %v2874_v28 }
 0x16d   : > { %2599 = vmatprep.subr.bf16.mxu0 %v3026_v15  ;;  %2631 = vmatprep.subr.bf16.mxu1 %v3026_v15 }
 0x16e   : > { %2601 = vmatprep.mubr.msk.bf16.mxu0 %vm3027_vm4, %v3026_v15  ;;  %2633 = vmatprep.mubr.msk.bf16.mxu1 %vm3027_vm4, %v3026_v15 }
 0x170   : > { %2600 = vmatpush3.bf16.msra.mxu0 %v2875_v30  ;;  %2632 = vmatpush3.bf16.msra.mxu1 %v2876_v31 }
 0x171   : > { %2605 = vmatprep.subr.bf16.mxu0 %v3026_v15  ;;  %2645 = vmatprep.subr.bf16.mxu1 %v3026_v15 }
 0x173   : > { %2602 = vmatmul.mubr.msk.bf16.vlgmr.msra.gmra.mrb[4].mxu0 %vm578_vm3, %v3242_v29  ;;  %2634 = vmatmul.mubr.msk.bf16.vlgmr.msra.gmra.mrb[4].mxu1 %vm578_vm3, %v3242_v29 }
 0x174   : > { %2606 = vmatpush3.bf16.msra.mxu0 %v2877_v32  ;;  %2646 = vmatpush3.bf16.msra.mxu1 %v2878_v33 }
 0x175   : > { %2607 = vmatprep.subr.bf16.mxu0 %v3026_v15  ;;  %2647 = vmatprep.subr.bf16.mxu1 %v3026_v15 }
 0x176   : > { %2609 = vmatprep.mubr.msk.bf16.mxu0 %vm3027_vm4, %v3026_v15  ;;  %2649 = vmatprep.mubr.msk.bf16.mxu1 %vm3027_vm4, %v3026_v15 }
 0x178   : > { %2608 = vmatpush3.bf16.msra.mxu0 %v2879_v34  ;;  %2648 = vmatpush3.bf16.msra.mxu1 %v2880_v35 }
 0x179   : > { %2621 = vmatprep.subr.bf16.mxu0 %v3026_v15  ;;  %2661 = vmatprep.subr.bf16.mxu1 %v3026_v15 }
 0x17b   : > { %2610 = vmatmul.mubr.msk.bf16.vlgmr.msra.gmra.mrb[8].mxu0 %vm578_vm3, %v3242_v29  ;;  %2650 = vmatmul.mubr.msk.bf16.vlgmr.msra.gmra.mrb[8].mxu1 %vm578_vm3, %v3242_v29 }
 0x17c   : > { %2622 = vmatpush3.bf16.msra.mxu0 %v2881_v36  ;;  %2662 = vmatpush3.bf16.msra.mxu1 %v2882_v37 }
 0x17d   : > { %2623 = vmatprep.subr.bf16.mxu0 %v3026_v15  ;;  %2663 = vmatprep.subr.bf16.mxu1 %v3026_v15 }
 0x17e   : > { %2625 = vmatprep.mubr.msk.bf16.mxu0 %vm3027_vm4, %v3026_v15  ;;  %2665 = vmatprep.mubr.msk.bf16.mxu1 %vm3027_vm4, %v3026_v15 }
 0x180   : > { %2624 = vmatpush3.bf16.msra.mxu0 %v2883_v38  ;;  %2664 = vmatpush3.bf16.msra.mxu1 %v2884_v39  ;;  %v2427_v38 = vld [vmem:[%s3681_s4] ss:$0 sm:$0xff] }
 0x181   : > { %2637 = vmatprep.subr.bf16.mxu0 %v3026_v15  ;;  %2677 = vmatprep.subr.bf16.mxu1 %v3026_v15 }
 0x183   : > { %2626 = vmatmul.mubr.msk.bf16.vlgmr.msra.gmra.mrb[12].mxu0 %vm578_vm3, %v3242_v29  ;;  %2666 = vmatmul.mubr.msk.bf16.vlgmr.msra.gmra.mrb[12].mxu1 %vm578_vm3, %v3242_v29 }
 0x184   : > { %2638 = vmatpush3.bf16.msra.mxu0 %v2885_v40  ;;  %2678 = vmatpush3.bf16.msra.mxu1 %v2886_v41  ;;  %v2433_v41 = vld [vmem:[%s3681_s4 + $0x6] ss:$0 sm:$0xff] }
 0x185   : > { %2639 = vmatprep.subr.bf16.mxu0 %v3026_v15  ;;  %2679 = vmatprep.subr.bf16.mxu1 %v3026_v15 }
 0x186   : > { %2641 = vmatprep.mubr.msk.bf16.mxu0 %vm3027_vm4, %v3026_v15  ;;  %2681 = vmatprep.mubr.msk.bf16.mxu1 %vm3027_vm4, %v3026_v15 }
 0x188   : > { %2640 = vmatpush3.bf16.msra.mxu0 %v2887_v42  ;;  %2680 = vmatpush3.bf16.msra.mxu1 %v2888_v43 }
 0x189   : > { %2653 = vmatprep.subr.bf16.mxu0 %v3026_v15  ;;  %2691 = vmatprep.subr.bf16.mxu1 %v3026_v15 }
 0x18b   : > { %2642 = vmatmul.mubr.msk.bf16.vlgmr.msra.gmra.mrb[16].mxu0 %vm578_vm3, %v3242_v29  ;;  %2682 = vmatmul.mubr.msk.bf16.vlgmr.msra.gmra.mrb[16].mxu1 %vm578_vm3, %v3242_v29 }
 0x18c   : > { %2654 = vmatpush3.bf16.msra.mxu0 %v2889_v44  ;;  %2657 = vmatprep.mubr.msk.bf16.mxu0 %vm3027_vm4, %v3026_v15 }
 0x18d   : > { %2655 = vmatprep.subr.bf16.mxu0 %v3026_v15  ;;  %2693 = vmatprep.mubr.msk.bf16.mxu1 %vm3027_vm4, %v3026_v15 }
 0x190   : > { %2656 = vmatpush3.bf16.msra.mxu0 %v2890_v45 }
 0x191   : > { %2669 = vmatprep.subr.bf16.mxu0 %v3026_v15 }
 0x193   : > { %2658 = vmatmul.mubr.msk.bf16.vlgmr.msra.gmra.mrb[20].mxu0 %vm578_vm3, %v3242_v29 }
 0x194   : > { %2670 = vmatpush3.bf16.msra.mxu0 %v2891_v46  ;;  %2673 = vmatprep.mubr.msk.bf16.mxu0 %vm3027_vm4, %v3026_v15 }
 0x195   : > { %2671 = vmatprep.subr.bf16.mxu0 %v3026_v15 }
 0x198   : > { %2672 = vmatpush3.bf16.msra.mxu0 %v2892_v47 }
 0x199   : > { %2685 = vmatprep.subr.bf16.mxu0 %v3026_v15 }
 0x19b   : > { %2674 = vmatmul.mubr.msk.bf16.vlgmr.msra.gmra.mrb[24].mxu0 %vm578_vm3, %v3242_v29 }
 0x19c   : > { %2687 = vmatprep.mubr.msk.bf16.mxu0 %vm3027_vm4, %v3026_v15 }
 0x23e   : > { %v3366_v48 = vpop.f32.mrb[0].mxu0  ;;  %v945_v49 = vpop.f32.mrb[0].mxu1 }
 0x23f   : > { %v2595_v50 = vpop.f32.mrb[1].mxu0  ;;  %v2619_v51 = vpop.f32.mrb[1].mxu1  ;;  %v946_v24 = vadd.f32 %v2430_v20, %v945_v49  ;;  %v790_v42 = vadd.f32 %v2427_v38, %v3366_v48  ;;  %v2429_v48 = vld [vmem:[%s3681_s4 + $0x2] ss:$0 sm:$0xff] }
 0x240   : > { %v792_v52 = vpop.f32.mrb[2].mxu0  ;;  %v948_v53 = vpop.f32.mrb[2].mxu1 }
 0x241   : > { %v2596_v54 = vpop.f32.mrb[3].mxu0  ;;  %v2620_v55 = vpop.f32.mrb[3].mxu1  ;;  %v1370_v33 = vpack.c.bf16 %v946_v24, %v946_v24  ;;  %v1367_v51 = vpack.c.bf16 %v790_v42, %v790_v42 }
 0x246   : > { %v841_v57 = vpop.f32.mrb[4].mxu0  ;;  %v1049_v58 = vpop.f32.mrb[4].mxu1 }
 0x247   : > { %v1050_v59 = vadd.f32 %v2432_v56, %v1049_v58  ;;  %v2603_v60 = vpop.f32.mrb[5].mxu0  ;;  %v2635_v61 = vpop.f32.mrb[5].mxu1  ;;  %v842_v7 = vadd.f32 %v2428_v3, %v841_v57  ;;  %v2435_v56 = vld [vmem:[%s3681_s4 + $0x8] ss:$0 sm:$0xff] }
 0x248   : > { %v844_v62 = vpop.f32.mrb[6].mxu0  ;;  %v1052_v63 = vpop.f32.mrb[6].mxu1 }
 0x249   : > { %v1372_v0 = vpack.c.bf16 %v1050_v59, %v1050_v59  ;;  %v2604_v1 = vpop.f32.mrb[7].mxu0  ;;  %v2636_v2 = vpop.f32.mrb[7].mxu1  ;;  %v1368_v16 = vpack.c.bf16 %v842_v7, %v842_v7 }
 0x24b   : > { %v1430_v4 = vsel %vm1379_vm5, %v1372_v0, 0 }
 0x24c   : > { %2692 = vmatpush3.bf16.xpose.msra.mxu1 %v1430_v4 }
 0x24d   : > { %2703 = vmatprep.subr.bf16.mxu1 %v3026_v15 }
 0x24e   : > { %v893_v8 = vpop.f32.mrb[8].mxu0  ;;  %v1153_v9 = vpop.f32.mrb[8].mxu1 }
 0x24f   : > { %v1154_v10 = vadd.f32 %v2434_v5, %v1153_v9  ;;  %v2611_v11 = vpop.f32.mrb[9].mxu0  ;;  %v2651_v12 = vpop.f32.mrb[9].mxu1  ;;  %v894_v57 = vadd.f32 %v2429_v48, %v893_v8 }
 0x250   : > { %v896_v13 = vpop.f32.mrb[10].mxu0  ;;  %v1156_v14 = vpop.f32.mrb[10].mxu1 }
 0x251   : > { %v1374_v17 = vpack.c.bf16 %v1154_v10, %v1154_v10  ;;  %v2612_v18 = vpop.f32.mrb[11].mxu0  ;;  %v2652_v19 = vpop.f32.mrb[11].mxu1  ;;  %v1369_v62 = vpack.c.bf16 %v894_v57, %v894_v57 }
 0x253   : > { %v1522_v21 = vsel %vm1379_vm5, %v1374_v17, 0  ;;  %2694 = vmatmul.mubr.msk.bf16.vlgmr.msra.gmra.mrb[20].mxu1 %vm1379_vm5, %v1368_v16  ;;  %v574_v16 = vld [vmem:[#allocation3] sm:$0xff] }
 0x254   : > { %2704 = vmatpush3.bf16.xpose.msra.mxu1 %v1522_v21  ;;  %2705 = vmatprep.mubr.msk.bf16.mxu1 %vm3027_vm4, %v3026_v15  ;;  %vm575_vm7 = vcmp.gt.f32.partialorder %v574_v16, 0.5 }
 0x255   : > { %2715 = vmatprep.subr.bf16.mxu1 %v3026_v15 }
 0x256   : > { %v997_v25 = vpop.f32.mrb[12].mxu0  ;;  %v1257_v26 = vpop.f32.mrb[12].mxu1 }
 0x257   : > { %v998_v27 = vadd.f32 %v2431_v22, %v997_v25  ;;  %v1258_v28 = vadd.f32 %v2436_v23, %v1257_v26  ;;  %v2627_v29 = vpop.f32.mrb[13].mxu0  ;;  %v2667_v30 = vpop.f32.mrb[13].mxu1 }
 0x258   : > { %v1000_v31 = vpop.f32.mrb[14].mxu0  ;;  %v1260_v32 = vpop.f32.mrb[14].mxu1 }
 0x259   : > { %v1371_v34 = vpack.c.bf16 %v998_v27, %v998_v27  ;;  %v1376_v35 = vpack.c.bf16 %v1258_v28, %v1258_v28  ;;  %v2628_v36 = vpop.f32.mrb[15].mxu0  ;;  %v2668_v37 = vpop.f32.mrb[15].mxu1 }
 0x25b   : > { %v1384_v39 = vsel %vm1379_vm5, %v1371_v34, 0  ;;  %v1669_v40 = vsel %vm1621_vm6, %v1376_v35, 0  ;;  %2706 = vmatmul.mubr.msk.bf16.vlgmr.msra.gmra.mrb[24].mxu1 %vm1379_vm5, %v1370_v33 }
 0x25c   : > { %2686 = vmatpush3.bf16.xpose.msra.mxu0 %v1384_v39  ;;  %2716 = vmatpush3.bf16.msra.mxu1 %v1669_v40 }
 0x25d   : > { %2697 = vmatprep.subr.bf16.mxu0 %v3026_v15  ;;  %2717 = vmatprep.mubr.msk.bf16.mxu1 %vm3027_vm4, %v3026_v15 }
 0x25e   : > { %v1101_v43 = vpop.f32.mrb[16].mxu0  ;;  %v3406_v44 = vpop.f32.mrb[16].mxu1  ;;  %2727 = vmatprep.subr.bf16.mxu1 %v3026_v15 }
 0x25f   : > { %v1102_v45 = vadd.f32 %v2433_v41, %v1101_v43  ;;  %v2643_v46 = vpop.f32.mrb[17].mxu0  ;;  %v2683_v47 = vpop.f32.mrb[17].mxu1 }
 0x260   : > { %v1104_v49 = vpop.f32.mrb[18].mxu0  ;;  %v1364_v50 = vpop.f32.mrb[18].mxu1 }
 0x261   : > { %v1373_v52 = vpack.c.bf16 %v1102_v45, %v1102_v45  ;;  %v2644_v53 = vpop.f32.mrb[19].mxu0  ;;  %v2684_v54 = vpop.f32.mrb[19].mxu1 }
 0x263   : > { %v1476_v55 = vsel %vm1379_vm5, %v1373_v52, 0  ;;  %2688 = vmatmul.mubr.msk.bf16.vlgmr.msra.gmra.mrb[28].mxu0 %vm1379_vm5, %v1367_v51 }
 0x264   : > { %2698 = vmatpush3.bf16.xpose.msra.mxu0 %v1476_v55  ;;  %2699 = vmatprep.mubr.msk.bf16.mxu0 %vm3027_vm4, %v3026_v15 }
 0x265   : > { %2709 = vmatprep.subr.bf16.mxu0 %v3026_v15 }
 0x266   : > { %v1205_v58 = vpop.f32.mrb[20].mxu0 }
 0x267   : > { %v1206_v59 = vadd.f32 %v2435_v56, %v1205_v58  ;;  %v2659_v60 = vpop.f32.mrb[21].mxu0  ;;  %v2437_v56 = vld [vmem:[%s3681_s4 + $0xa] ss:$0 sm:$0xff] }
 0x268   : > { %v1208_v61 = vpop.f32.mrb[22].mxu0 }
 0x269   : > { %v1375_v63 = vpack.c.bf16 %v1206_v59, %v1206_v59  ;;  %v2660_v0 = vpop.f32.mrb[23].mxu0  ;;  %v2438_v59 = vld [vmem:[%s3681_s4 + $0xb] ss:$0 sm:$0xff] }
 0x26b   : > { %v1623_v1 = vsel %vm1621_vm6, %v1375_v63, 0  ;;  %2700 = vmatmul.mubr.msk.bf16.vlgmr.msra.gmra.mrb[32].mxu0 %vm1379_vm5, %v1369_v62  ;;  %v1362_v62 = vadd.f32 %v2438_v59, %v3406_v44 }
 0x26c   : > { %2710 = vmatpush3.bf16.msra.mxu0 %v1623_v1  ;;  %2711 = vmatprep.mubr.msk.bf16.mxu0 %vm3027_vm4, %v3026_v15 }
 0x26d   : > { %2721 = vmatprep.subr.bf16.mxu0 %v3026_v15 }
 0x26e   : > { %v3425_v2 = vpop.f32.mrb[24].mxu0 }
 0x26f   : > { %v2675_v3 = vpop.f32.mrb[25].mxu0  ;;  %v1310_v57 = vadd.f32 %v2437_v56, %v3425_v2 }
 0x270   : > { %v1312_v4 = vpop.f32.mrb[26].mxu0 }
 0x271   : > { %v2676_v5 = vpop.f32.mrb[27].mxu0  ;;  %v1377_v63 = vpack.c.bf16 %v1310_v57, %v1310_v57  ;;  %v1378_v4 = vpack.c.bf16 %v1362_v62, %v1362_v62 }
 0x273   : > { %v1715_v5 = vsel %vm1621_vm6, %v1377_v63, 0  ;;  %v1761_v44 = vsel %vm1621_vm6, %v1378_v4, 0  ;;  %v2487_v4 = vld [vmem:[%s3640_s6] ss:$0 sm:$0xff] }
 0x326   : > { %v1466_v7 = vpop.f32.mrb[20].mxu1 }
 0x327   : > { %v2695_v8 = vpop.f32.mrb[21].mxu1  ;;  %v1567_v22 = vsel %vm575_vm7, %v1466_v7, -10000.0 }
 0x328   : > { %v1469_v9 = vpop.f32.mrb[22].mxu1  ;;  %v1573_v24 = vsel %vm1379_vm5, %v1567_v22, -inf }
 0x329   : > { %v2696_v10 = vpop.f32.mrb[23].mxu1 }
 0x32a   : > { %v1807_v10 = vld [vmem:[%s3682_s5] sm:$0xf] }
 0x32e   : > { %v1558_v11 = vpop.f32.mrb[24].mxu1 }
 0x32f   : > { %v2707_v12 = vpop.f32.mrb[25].mxu1  ;;  %v1569_v25 = vsel %vm575_vm7, %v1558_v11, -10000.0 }
 0x330   : > { %v1561_v13 = vpop.f32.mrb[26].mxu1  ;;  %v1579_v30 = vsel %vm1379_vm5, %v1569_v25, -inf }
 0x331   : > { %v2708_v14 = vpop.f32.mrb[27].mxu1 }
 0x332   : > { %v1815_v14 = vsel %vm1621_vm6, %v1807_v10, 0 }
 0x336   : > { %v1420_v17 = vpop.f32.mrb[28].mxu0 }
 0x337   : > { %v1566_v18 = vsel %vm575_vm7, %v1420_v17, -10000.0  ;;  %v2689_v19 = vpop.f32.mrb[29].mxu0  ;;  %v1808_v17 = vld [vmem:[%s3682_s5 + $0x4] sm:$0xf] }
 0x338   : > { %v1423_v20 = vpop.f32.mrb[30].mxu0  ;;  %v1570_v21 = vsel %vm1379_vm5, %v1566_v18, -inf  ;;  %v1809_v19 = vld [vmem:[%s3682_s5 + $0x8] sm:$0xf] }
 0x339   : > { %1571 = vmax.xlane.f32.xlu1 %v1570_v21  ;;  %v2690_v23 = vpop.f32.mrb[31].mxu0 }
 0x33a   : > { %v1907_v23 = vsel %vm1621_vm6, %v1809_v19, 0  ;;  %v2488_v19 = vld [vmem:[%s3641_s7] ss:$0 sm:$0xff] }
 0x33d   : > { %1574 = vmax.xlane.f32.xlu1 %v1573_v24 }
 0x33e   : > { %v1512_v26 = vpop.f32.mrb[32].mxu0 }
 0x33f   : > { %v1568_v27 = vsel %vm575_vm7, %v1512_v26, -10000.0  ;;  %v2701_v28 = vpop.f32.mrb[33].mxu0 }
 0x340   : > { %v1515_v29 = vpop.f32.mrb[34].mxu0  ;;  %v1576_v31 = vsel %vm1379_vm5, %v1568_v27, -inf }
 0x341   : > { %1580 = vmax.xlane.f32.xlu1 %v1579_v30  ;;  %1577 = vmax.xlane.f32.xlu0 %v1576_v31  ;;  %v2702_v32 = vpop.f32.mrb[35].mxu0 }
 0x3c6   : > { %v1572_v33 = vpop.xlane.xlu1 %1571 }
 0x3c7   : > { %v1582_v34 = vsub.f32 %v1566_v18, %v1572_v33  ;;  %v1861_v18 = vsel %vm1621_vm6, %v1808_v17, 0 }
 0x3c9   : > { %v1586_v35 = vmul.f32 1.442695, %v1582_v34 }
 0x3ca   : > { %v1575_v36 = vpop.xlane.xlu1 %1574 }
 0x3cb   : > { %2905 = vpow2.f32 %v1586_v35  ;;  %v1583_v37 = vsub.f32 %v1567_v22, %v1575_v36 }
 0x3cd   : > { %v1588_v38 = vmul.f32 1.442695, %v1583_v37 }
 0x3ce   : > { %v1581_v39 = vpop.xlane.xlu1 %1580  ;;  %v1578_v40 = vpop.xlane.xlu0 %1577 }
 0x3cf   : > { %2907 = vpow2.f32 %v1588_v38  ;;  %v1585_v41 = vsub.f32 %v1569_v25, %v1581_v39  ;;  %v1584_v42 = vsub.f32 %v1568_v27, %v1578_v40  ;;  %v1810_v25 = vld [vmem:[%s3682_s5 + $0xc] sm:$0xf] }
 0x3d0   : > { %v1953_v30 = vsel %vm1621_vm6, %v1810_v25, 0  ;;  %v2896_v25 = vld [vmem:[%s3645_s11 + $0x8] sm:$0xff]  }
 0x3d1   : > { %v1592_v43 = vmul.f32 1.442695, %v1585_v41  ;;  %v1590_v45 = vmul.f32 1.442695, %v1584_v42 }
 0x3d3   : > { %2909 = vpow2.f32 %v1592_v43 }
 0x3d4   : > { %2911 = vpow2.f32 %v1590_v45 }
 0x3d5   : > { %v2906_v46 = vpop.eup %2905 }
 0x3d6   : > { %v1594_v47 = vsel %vm1379_vm5, %v2906_v46, 0.0 }
 0x3d7   : > { %1595 = vadd.xlane.f32.xlu0 %v1594_v47 }
 0x3d9   : > { %v2908_v49 = vpop.eup %2907 }
 0x3da   : > { %v1597_v50 = vsel %vm1379_vm5, %v2908_v49, 0.0 }
 0x3db   : > { %1598 = vadd.xlane.f32.xlu1 %v1597_v50 }
 0x3dd   : > { %v2910_v51 = vpop.eup %2909 }
 0x3de   : > { %v2912_v52 = vpop.eup %2911  ;;  %v1603_v53 = vsel %vm1379_vm5, %v2910_v51, 0.0 }
 0x3df   : > { %1604 = vadd.xlane.f32.xlu1 %v1603_v53  ;;  %v1600_v54 = vsel %vm1379_vm5, %v2912_v52, 0.0 }
 0x3e0   : > { %1601 = vadd.xlane.f32.xlu0 %v1600_v54 }
 0x464   : > { %v1596_v48 = vpop.xlane.xlu0 %1595 }
 0x465   : > { %2913 = vrcp.f32 %v1596_v48 }
 0x468   : > { %v1599_v55 = vpop.xlane.xlu1 %1598 }
 0x469   : > { %2915 = vrcp.f32 %v1599_v55 }
 0x46c   : > { %v1605_v58 = vpop.xlane.xlu1 %1604 }
 0x46d   : > { %2917 = vrcp.f32 %v1605_v58  ;;  %v1602_v60 = vpop.xlane.xlu0 %1601 }
 0x46e   : > { %2919 = vrcp.f32 %v1602_v60 }
 0x46f   : > { %v2914_v61 = vpop.eup %2913 }
 0x470   : > { %v1610_v0 = vmul.f32 %v2914_v61, %v2906_v46 }
 0x472   : > { %v1614_v1 = vpack.c.bf16 %v1610_v0, %v1610_v0 }
 0x473   : > { %v2916_v3 = vpop.eup %2915 }
 0x474   : > { %v1611_v7 = vmul.f32 %v2916_v3, %v2908_v49  ;;  %2712 = vmatmul.mubr.msk.bf16.vlgmr.msra.gmra.mrb[36].mxu0 %vm1379_vm5, %v1614_v1 }
 0x475   : > { %2722 = vmatpush3.bf16.msra.mxu0 %v1715_v5  ;;  %2723 = vmatprep.mubr.msk.bf16.mxu0 %vm3027_vm4, %v3026_v15 }
 0x476   : > { %v1615_v2 = vpack.c.bf16 %v1611_v7, %v1611_v7  ;;  %2733 = vmatprep.subr.bf16.mxu0 %v3026_v15 }
 0x477   : > { %v2918_v8 = vpop.eup %2917 }
 0x478   : > { %v2920_v9 = vpop.eup %2919  ;;  %2718 = vmatmul.mubr.msk.bf16.vlgmr.msra.gmra.mrb[28].mxu1 %vm1379_vm5, %v1615_v2  ;;  %v1613_v12 = vmul.f32 %v2918_v8, %v2910_v51 }
 0x479   : > { %v1612_v11 = vmul.f32 %v2920_v9, %v2912_v52  ;;  %2728 = vmatpush3.bf16.msra.mxu1 %v1761_v44  ;;  %2729 = vmatprep.mubr.msk.bf16.mxu1 %vm3027_vm4, %v3026_v15 }
 0x47a   : > { %2739 = vmatprep.subr.bf16.mxu1 %v3026_v15  ;;  %v1617_v16 = vpack.c.bf16 %v1613_v12, %v1613_v12  ;;  %v2893_v12 = vld [vmem:[%s3643_s9] sm:$0xff]  }
 0x47b   : > { %v1616_v13 = vpack.c.bf16 %v1612_v11, %v1612_v11 }
 0x47d   : > { %2724 = vmatmul.mubr.msk.bf16.vlgmr.msra.gmra.mrb[40].mxu0 %vm1379_vm5, %v1616_v13  ;;  %v2895_v13 = vld [vmem:[%s3645_s11] sm:$0xff]  }
 0x47e   : > { %2734 = vmatpush3.bf16.msra.mxu0 %v1815_v14  ;;  %2735 = vmatprep.mubr.msk.bf16.mxu0 %vm3027_vm4, %v3026_v15 }
 0x47f   : > { %2745 = vmatprep.subr.bf16.mxu0 %v3026_v15 }
 0x480   : > { %2730 = vmatmul.mubr.msk.bf16.vlgmr.msra.gmra.mrb[32].mxu1 %vm1379_vm5, %v1617_v16 }
 0x481   : > { %2741 = vmatprep.mubr.msk.bf16.mxu1 %vm3027_vm4, %v3026_v15  ;;  %2740 = vmatpush3.bf16.msra.mxu1 %v1861_v18 }
 0x482   : > { %2751 = vmatprep.subr.bf16.mxu1 %v3026_v15 }
 0x547   : > { %v1659_v20 = vpop.f32.mrb[36].mxu0 }
 0x548   : > { %v1803_v21 = vpack.c.bf16 %v1659_v20, %v1659_v20  ;;  %v2713_v22 = vpop.f32.mrb[37].mxu0 }
 0x549   : > { %v1662_v24 = vpop.f32.mrb[38].mxu0 }
 0x54a   : > { %v2714_v26 = vpop.f32.mrb[39].mxu0  ;;  %2736 = vmatmul.mubr.msk.bf16.vlgmr.msra.gmra.mrb[44].mxu0 %vm1379_vm5, %v1803_v21  ;;  %v2489_v21 = vld [vmem:[%s3642_s8] ss:$0 sm:$0xff] }
 0x54b   : > { %v1705_v27 = vpop.f32.mrb[28].mxu1  ;;  %2746 = vmatpush3.bf16.msra.mxu0 %v1907_v23  ;;  %2747 = vmatprep.mubr.msk.bf16.mxu0 %vm3027_vm4, %v3026_v15  ;;  %v2897_v26 = vld [vmem:[%s3645_s11 + $0x10] sm:$0xff]  }
 0x54c   : > { %v1804_v28 = vpack.c.bf16 %v1705_v27, %v1705_v27  ;;  %v2719_v29 = vpop.f32.mrb[29].mxu1  ;;  %2757 = vmatprep.subr.bf16.mxu0 %v3026_v15  ;;  %v2898_v27 = vld [vmem:[%s3645_s11 + $0x18] sm:$0xff]  }
 0x54d   : > { %v1708_v31 = vpop.f32.mrb[30].mxu1  ;;  %v2900_v29 = vld [vmem:[%s3645_s11 + $0x28] sm:$0xff]  }
 0x54e   : > { %v2720_v32 = vpop.f32.mrb[31].mxu1  ;;  %2742 = vmatmul.mubr.msk.bf16.vlgmr.msra.gmra.mrb[36].mxu1 %vm1379_vm5, %v1804_v28  ;;  %v2899_v28 = vld [vmem:[%s3645_s11 + $0x20] sm:$0xff]   ;;  %v2902_v31 = vld [vmem:[%s3645_s11 + $0x38] sm:$0xff]  }
 0x54f   : > { %2752 = vmatpush3.bf16.msra.mxu1 %v1953_v30  ;;  %2753 = vmatprep.mubr.msk.bf16.mxu1 %vm3027_vm4, %v3026_v15  ;;  %v2901_v30 = vld [vmem:[%s3645_s11 + $0x30] sm:$0xff]   ;;  %v2490_v32 = vld [vmem:[%s3644_s10] ss:$0 sm:$0xff] }
 0x550   : > { %v1751_v33 = vpop.f32.mrb[40].mxu0  ;;  %2765 = vmatprep.subr.bf16.mxu1 %v3026_v15 }
 0x551   : > { %v1805_v34 = vpack.c.bf16 %v1751_v33, %v1751_v33  ;;  %v2725_v35 = vpop.f32.mrb[41].mxu0 }
 0x552   : > { %v1754_v36 = vpop.f32.mrb[42].mxu0 }
 0x553   : > { %v2726_v37 = vpop.f32.mrb[43].mxu0  ;;  %2748 = vmatmul.mubr.msk.bf16.vlgmr.msra.gmra.mrb[48].mxu0 %vm1379_vm5, %v1805_v34  ;;  %v1797_v38 = vpop.f32.mrb[32].mxu1 }
 0x554   : > { %v1806_v39 = vpack.c.bf16 %v1797_v38, %v1797_v38  ;;  %v2731_v40 = vpop.f32.mrb[33].mxu1  ;;  %2761 = vmatprep.mubr.msk.bf16.mxu0 %vm3027_vm4, %v3026_v15  ;;  %2758 = vmatpush3.bf16.msra.mxu0 %v2893_v12 }
 0x555   : > { %v1800_v41 = vpop.f32.mrb[34].mxu1  ;;  %2759 = vmatprep.subr.bf16.mxu0 %v3026_v15 }
 0x556   : > { %v2732_v42 = vpop.f32.mrb[35].mxu1  ;;  %2754 = vmatmul.mubr.msk.bf16.vlgmr.msra.gmra.mrb[40].mxu1 %vm1379_vm5, %v1806_v39 }
 0x557   : > { %2781 = vmatprep.mubr.msk.bf16.mxu1 %vm3027_vm4, %v3026_v15  ;;  %2766 = vmatpush3.bf16.msra.mxu1 %v2895_v13 }
 0x558   : > { %2767 = vmatprep.subr.bf16.mxu1 %v3026_v15 }
 0x55b   : > { %2768 = vmatpush3.bf16.msra.mxu1 %v2896_v25 }
 0x55c   : > { %2769 = vmatprep.subr.bf16.mxu1 %v3026_v15 }
 0x55f   : > { %2770 = vmatpush3.bf16.msra.mxu1 %v2897_v26 }
 0x560   : > { %2771 = vmatprep.subr.bf16.mxu1 %v3026_v15 }
 0x563   : > { %2772 = vmatpush3.bf16.msra.mxu1 %v2898_v27 }
 0x564   : > { %2773 = vmatprep.subr.bf16.mxu1 %v3026_v15 }
 0x567   : > { %2774 = vmatpush3.bf16.msra.mxu1 %v2899_v28 }
 0x568   : > { %2775 = vmatprep.subr.bf16.mxu1 %v3026_v15 }
 0x56b   : > { %2776 = vmatpush3.bf16.msra.mxu1 %v2900_v29 }
 0x56c   : > { %2777 = vmatprep.subr.bf16.mxu1 %v3026_v15 }
 0x56f   : > { %2778 = vmatpush3.bf16.msra.mxu1 %v2901_v30 }
 0x570   : > { %2779 = vmatprep.subr.bf16.mxu1 %v3026_v15 }
 0x573   : > { %2780 = vmatpush3.bf16.msra.mxu1 %v2902_v31 }
 0x61d   : > { %v1851_v43 = vpop.f32.mrb[44].mxu0 }
 0x61e   : > { %v2737_v45 = vpop.f32.mrb[45].mxu0  ;;  %v1995_v50 = vsel %vm578_vm3, %v1851_v43, 0.0 }
 0x61f   : > { %v1854_v46 = vpop.f32.mrb[46].mxu0 }
 0x620   : > { %v2738_v47 = vpop.f32.mrb[47].mxu0 }
 0x621   : > { %v1897_v49 = vpop.f32.mrb[36].mxu1 }
 0x622   : > { %v1996_v51 = vsel %vm578_vm3, %v1897_v49, 0.0  ;;  %v2743_v52 = vpop.f32.mrb[37].mxu1  ;;  %v2494_v49 = vld [vmem:[%s3646_s12] ss:$0 sm:$0xff] }
 0x623   : > { %v1997_v53 = vadd.f32 %v1996_v51, %v1995_v50  ;;  %v1900_v54 = vpop.f32.mrb[38].mxu1 }
 0x624   : > { %v2744_v48 = vpop.f32.mrb[39].mxu1 }
 0x626   : > { %v1943_v55 = vpop.f32.mrb[48].mxu0 }
 0x627   : > { %v1998_v56 = vsel %vm578_vm3, %v1943_v55, 0.0  ;;  %v2749_v57 = vpop.f32.mrb[49].mxu0 }
 0x628   : > { %v1999_v58 = vadd.f32 %v1998_v56, %v1997_v53  ;;  %v1946_v59 = vpop.f32.mrb[50].mxu0 }
 0x629   : > { %v2750_v60 = vpop.f32.mrb[51].mxu0  ;;  %v1989_v61 = vpop.f32.mrb[40].mxu1 }
 0x62a   : > { %v2000_v62 = vsel %vm578_vm3, %v1989_v61, 0.0  ;;  %v2755_v63 = vpop.f32.mrb[41].mxu1 }
 0x62b   : > { %v2001_v0 = vadd.f32 %v2000_v62, %v1999_v58  ;;  %v1992_v1 = vpop.f32.mrb[42].mxu1  ;;  %v2925_v62 = vld [vmem:[%s3649_s15] sm:$0xff] (!%p2503_p0)   ;;  %v3028_v63 = vmov (!%p2503_p0), 0.0  }
 0x62c   : > { %v2756_v3 = vpop.f32.mrb[43].mxu1 }
 0x62d   : > { %v2002_v5 = vadd.f32 %v2001_v0, %v3202_v6  ;;  %v2894_v6 = vld [vmem:[%s3643_s9 + $0x8] sm:$0xff]  }
 0x62e   : > { %2760 = vmatpush3.bf16.msra.mxu0 %v2894_v6  ;;  %v2926_v0 = vld [vmem:[%s3649_s15 + $0x8] sm:$0xff] (!%p2503_p0)  }
 0x62f   : > { %v3499_v7 = vadd.f32 %v2487_v4, %v2002_v5  ;;  %2785 = vmatprep.subr.bf16.mxu0 (!%p2503_p0), %v3028_v63 }
 0x631   : > { %v2013_v2 = vsel %vm578_vm3, %v3499_v7, 0.0 }
 0x632   : > { %2014 = vadd.xlane.f32.xlu0 %v2013_v2 }
 0x6bf   : > { %v2015_v8 = vpop.xlane.xlu0 %2014 }
 0x6c0   : > { %v2016_v9 = vmul.f32 0.03125, %v2015_v8  ;;  %v2505_v8 = vld [vmem:[%s3648_s14] ss:$0 sm:$0xff] (!%p2503_p0) }
 0x6c2   : > { %v2017_v44 = vsub.f32 %v3499_v7, %v2016_v9 }
 0x6c4   : > { %v2018_v10 = vmul.f32 %v2017_v44, %v2017_v44 }
 0x6c6   : > { %v2019_v11 = vsel %vm578_vm3, %v2018_v10, 0.0 }
 0x6c7   : > { %2020 = vadd.xlane.f32.xlu1 %v2019_v11  ;;  %v2506_v11 = vld [vmem:[%s3650_s16] ss:$0 sm:$0xff] (!%p2503_p0) }
 0x754   : > { %v2021_v14 = vpop.xlane.xlu1 %2020 }
 0x755   : > { %v2022_v16 = vmul.f32 0.03125, %v2021_v14 }
 0x757   : > { %v2023_v17 = vadd.f32 1e-05, %v2022_v16 }
 0x759   : > { %2921 = vrsqrt.f32 %v2023_v17 }
 0x763   : > { %v2922_v18 = vpop.eup %2921 }
 0x764   : > { %v2025_v20 = vmul.f32 %v2922_v18, %v2017_v44 }
 0x766   : > { %v2032_v22 = vmul.f32 %v2488_v19, %v2025_v20 }
 0x768   : > { %v2039_v23 = vadd.f32 %v2489_v21, %v2032_v22 }
 0x76a   : > { %v2040_v24 = vpack.c.bf16 %v2039_v23, %v2039_v23 }
 0x76c   : > { %2762 = vmatmul.mubr.msk.bf16.vlgmr.msra.gmra.mrb[52].mxu0 %vm578_vm3, %v2040_v24 }
 0x76d   : > { %2789 = vmatprep.mubr.msk.bf16.mxu0 (!%p2503_p0), %vm3029_vm8, %v3028_v63  ;;  %2786 = vmatpush3.bf16.msra.mxu0 (!%p2503_p0), %v2925_v62 }
 0x76e   : > { %2787 = vmatprep.subr.bf16.mxu0 (!%p2503_p0), %v3028_v63 }
 0x771   : > { %2788 = vmatpush3.bf16.msra.mxu0 (!%p2503_p0), %v2926_v0 }
 0x83f   : > { %v2101_v33 = vpop.f32.mrb[52].mxu0 }
 0x840   : > { %v2102_v34 = vadd.f32 %v2490_v32, %v2101_v33  ;;  %v2763_v35 = vpop.f32.mrb[53].mxu0 }
 0x841   : > { %v2104_v36 = vpop.f32.mrb[54].mxu0 }
 0x842   : > { %v2108_v37 = vmul.f32 0.044715, %v2102_v34  ;;  %v2764_v38 = vpop.f32.mrb[55].mxu0  ;;  %v2107_v45 = vmul.f32 0.5, %v2102_v34 }
 0x844   : > { %v2109_v39 = vmul.f32 %v2108_v37, %v2102_v34 }
 0x846   : > { %v2110_v40 = vmul.f32 %v2109_v39, %v2102_v34 }
 0x848   : > { %v2111_v41 = vadd.f32 %v2110_v40, %v2102_v34 }
 0x84a   : > { %v2112_v42 = vmul.f32 0.7978845, %v2111_v41 }
 0x84c   : > { %2923 = vtanh.f32 %v2112_v42 }
 0x856   : > { %v2924_v43 = vpop.eup %2923 }
 0x857   : > { %v2114_v46 = vadd.f32 1.0, %v2924_v43 }
 0x859   : > { %v2115_v15 = vmul.f32 %v2114_v46, %v2107_v45 }
 0x85b   : > { %v2116_v47 = vpack.c.bf16 %v2115_v15, %v2115_v15 }
 0x85d   : > { %2782 = vmatmul.mubr.bf16.vlgmr.msra.gmra.mrb[44].mxu1 %v2116_v47 }
 0x92f   : > { %2233 = sbr.rel (%p2503_p0) target bundleno = 2895 (0xb4f), region = 96 }
 0x930   : > { %v2222_v50 = vpop.f32.mrb[44].mxu1 }
 0x931   : > { %v2223_v51 = vadd.f32 %v2494_v49, %v2222_v50  ;;  %v2783_v52 = vpop.f32.mrb[45].mxu1 }
 0x932   : > { %v2225_v53 = vpop.f32.mrb[46].mxu1 }
 0x933   : > { %v2228_v54 = vadd.f32 %v2223_v51, %v3499_v7  ;;  %v2784_v48 = vpop.f32.mrb[47].mxu1  ;;  %v2504_v7 = vld [vmem:[%s3647_s13] ss:$0 sm:$0xff] (!%p2503_p0) }
 0x935   : > { %2229 = vst.msk [vmem:[#allocation2] sm:$0xff] %vm578_vm3, %v2228_v54 }
 0x93c   : > { %v2234_v55 = vld [vmem:[#allocation2] sm:$0xff] }
 0x93d   : > { %v2237_v56 = vsel %vm578_vm3, %v2234_v55, 0.0 }
 0x93e   : > { %2238 = vadd.xlane.f32.xlu0 %v2237_v56 }
 0x9cb   : > { %v2239_v57 = vpop.xlane.xlu0 %2238 }
 0x9cc   : > { %v2240_v58 = vmul.f32 0.03125, %v2239_v57 }
 0x9ce   : > { %v2241_v59 = vsub.f32 %v2234_v55, %v2240_v58 }
 0x9d0   : > { %v2242_v60 = vmul.f32 %v2241_v59, %v2241_v59 }
 0x9d2   : > { %v2243_v61 = vsel %vm578_vm3, %v2242_v60, 0.0 }
 0x9d3   : > { %2244 = vadd.xlane.f32.xlu0 %v2243_v61 }
 0xa60   : > { %v2245_v1 = vpop.xlane.xlu0 %2244 }
 0xa61   : > { %v2246_v3 = vmul.f32 0.03125, %v2245_v1 }
 0xa63   : > { %v2247_v4 = vadd.f32 1e-05, %v2246_v3 }
 0xa65   : > { %2927 = vrsqrt.f32 %v2247_v4 }
 0xa6f   : > { %v2928_v5 = vpop.eup %2927 }
 0xa70   : > { %v2249_v2 = vmul.f32 %v2928_v5, %v2241_v59 }
 0xa72   : > { %v2256_v9 = vmul.f32 %v2504_v7, %v2249_v2 }
 0xa74   : > { %v2263_v44 = vadd.f32 %v2505_v8, %v2256_v9 }
 0xa76   : > { %v2264_v10 = vpack.c.bf16 %v2263_v44, %v2263_v44 }
 0xa78   : > { %2790 = vmatmul.mubr.msk.bf16.vlgmr.msra.gmra.mrb[0].mxu0 %vm578_vm3, %v2264_v10 }
 0xb4b   : > { %v2325_v12 = vpop.f32.mrb[0].mxu0 }
 0xb4c   : > { %v2326_v6 = vadd.f32 %v2506_v11, %v2325_v12  ;;  %v2791_v13 = vpop.f32.mrb[1].mxu0 }
 0xb4d   : > { %v2328_v14 = vpop.f32.mrb[2].mxu0 }
 0xb4e   : > { %2331 = vst [vmem:[%s3683_s17] sm:$0xff] %v2326_v6  ;;  %v2792_v16 = vpop.f32.mrb[3].mxu0 }
 0xb4f PF: > { %s2511_s24 = sshll.u32 %s3011_s28, 7  ;;  %s3684_s30 = sld [smem:[#allocation20_spill]] }
 0xb50   : > { %s3686_s23 = scalar_lea.vmem [#allocation4], %s3194_s29  ;;  %s3687_s18 = sand.u32 1, %s2999_s25  }
 0xb51   : > { %s2346_s22 = sshll.u32 %s3686_s23, 4  ;;  %s2333_s2 = scalar_lea.sflag [#allocation5], %s3687_s18  ;;  %s2347_s22 = int_to_ptr.vmem [resolvable:$true] %s2346_s22 }
 0xb52   : > { %s2929_s3 = scalar_lea.vmem %s2347_s22, 128  ;;  %s3030_s17 = smov [#allocation4]  }
 0xb53   : > { %p2930_p1 = scmp.ne.s32.totalorder %s2347_s22, %s2929_s3  ;;  %s2933_s4 = sshll.u32 %s3030_s17, 4  ;;  %s2934_s4 = int_to_ptr.vmem [resolvable:$false] %s2933_s4 }
 0xb54   : > { %s2935_s5 = scalar_lea.vmem %s2934_s4, 256  ;;  %p2936_p5 = scmp.lt.s32.totalorder %s2347_s22, %s2934_s4 }
 0xb55   : > { %s3685_s20 = smov %s3684_s30  ;;  %s3583_s19 = scalar_lea.hbm %s3684_s30, %s2511_s24 }
 0xb56   : > { %p2931_p2 = pnand %p2930_p1, %p3170_p3  ;;  %p2937_p6 = scmp.lt.s32.totalorder %s2935_s5, %s2929_s3 }
 0xb58   : > { %p2932_p4 = pneg %p2931_p2  ;;  %p2938_p7 = por %p2937_p6, %p2936_p5 }
 0xb5a   : > { %p2939_p8 = pnand %p2938_p7, %p2932_p4 }
 0xb5c   : > { %2942 = shalt.err (!%p2939_p8)
}
 0xb5d   : > { %s2943_s28 = scalar_lea.hbm %s3583_s19, 128  ;;  %s2947_s27 = scalar_lea.hbm %s3685_s20, 256 }
 0xb5e   : > { %p2944_p10 = scmp.ne.s32.totalorder %s3583_s19, %s2943_s28  ;;  %p2948_p13 = scmp.lt.u32.totalorder %s3583_s19, %s3685_s20 }
 0xb5f   : > { %p2949_p0 = scmp.lt.u32.totalorder %s2947_s27, %s2943_s28  ;;  %p2951_p2 = scmp.lt.u32.totalorder %s2943_s28, %s3583_s19 }
 0xb60   : > { %p2945_p11 = pnand %p2944_p10, %p3170_p3 }
 0xb61   : > { %p2950_p1 = por %p2949_p0, %p2948_p13 }
 0xb62   : > { %p2946_p12 = pneg %p2945_p11 }
 0xb63   : > { %p2952_p4 = por %p2951_p2, %p2950_p1 }
 0xb65   : > { %p2953_p5 = pnand %p2952_p4, %p2946_p12 }
 0xb67   : > { %2956 = shalt.err (!%p2953_p5)
}
 0xb68   : > { %2793 = dma.vmem_to_hbm [thread:$0]  (%p3170_p3), %s2347_s22, 128, %s3583_s19, %s2333_s2  }
 0xb69 PF: > { %s3688_s3 = sld [smem:[#allocation10_spill]]  ;;  %s3689_s5 = sld [smem:[#allocation7_spill]] }
 0xb6f   : > { %p2799_p6 = scmp.ge.s32.totalorder %s3688_s3, 2  ;;  %s2358_s23 = sand.u32 1, %s3689_s5  }
 0xb70   : > { %s2359_s18 = scalar_lea.sflag [#allocation5], %s2358_s23 }
 0xb71   : > { %p2796_p7 = pnand %p2799_p6, %p3180_p9 }
 0xb73   : > { %2990 = dma.done.wait (!%p2796_p7), %s2359_s18, 128  }
 0xb74   : > { %2992 = vsyncadd (!%p2796_p7), %s2359_s18, 4294967168  ;;  %s30_s30 = sadd.s32 1, %s3688_s3   ;;  %s3691_s27 = sld [smem:[#allocation8_spill]] }
 0xb75   : > { %p27_p8 = scmp.ge.s32.totalorder %s30_s30, 6   ;;  %s3692_s28 = sld [smem:[#allocation9_spill]] }
 0xb76   : > { %s3693_s29 = sld [smem:[#allocation11_spill]]  ;;  %s3694_s0 = sld [smem:[#allocation12_spill]] }
 0xb77   : > { %s3695_s24 = smov %s2999_s25  ;;  %s3696_s25 = smov %s3003_s26 }
 0xb78   : > { %s3697_s26 = smov %s3188_s1  ;;  %29 = sbr.rel (!%p27_p8) target bundleno = 13 (0xd), region = 131 }
 0xb7f   :  { %2364 = vsyncpa [#allocation5], 1 }
 0xb80   :  { %2366 = vsyncpa [#allocation5 + $0x1], 1 }

</bundles_post_ra>
